<compile_context>
chip_gen: v5e
topology: v5e:2x2
jax: 0.10.0
libtpu: 0.0.40
codegen_flags: <defaults>
</compile_context>

<pallas_src>
import functools

import jax
import jax.numpy as jnp
from jax.experimental import pallas as pl
from jax.experimental.pallas import tpu as pltpu


def _norm_backpack_kernel(upd_ref, base_ref, eps_ref, sel_ref, ctx_ref,
                          hid_ref, senses_out_ref, mod_out_ref,
                          rhs_ref, *, row_block):
    """Grid point = (batch b, sense k, row tile q).

    Per (b, k), at q == 0 (results stay resident across the row-tile axis):
      modification = where(selector != 0, update, 0)         (in-kernel mask)
      senses'      = (senses + modification) * epsilon
    Per (b, k, q):
      hidden[b, rows(q), :]  = ctx_bf16[b, k, rows(q), :] @ senses'_bf16   (k == 0)
      hidden[b, rows(q), :] += ctx_bf16[b, k, rows(q), :] @ senses'_bf16   (k  > 0)
    """
    k = pl.program_id(1)
    q = pl.program_id(2)

    # Elementwise sense update: once per (b, k); results stay resident in the
    # output VMEM buffers / bf16 scratch across the row-tile axis.
    @pl.when(q == 0)
    def _():
        mod = jnp.where(sel_ref[...] != 0.0, upd_ref[...], 0.0)      # (seq, d) f32
        s_new = (base_ref[...] + mod) * eps_ref[...]                 # eps (seq, 1) bcast
        mod_out_ref[...] = mod.astype(mod_out_ref.dtype)
        senses_out_ref[...] = s_new.astype(senses_out_ref.dtype)
        rhs_ref[...] = s_new.astype(jnp.bfloat16)

    # Row-tiled contextualization matmul: bf16 operands (ctx already bf16 from
    # the wrapper), f32 accumulation on the MXU.
    contrib = jnp.dot(ctx_ref[...], rhs_ref[...],
                      preferred_element_type=jnp.float32)            # (tq, d)

    row = pl.multiple_of(q * row_block, row_block)
    sl = pl.ds(row, row_block)

    # First sense overwrites the resident hidden block (no zero pass needed);
    # subsequent senses accumulate.
    @pl.when(k == 0)
    def _():
        hid_ref[sl, :] = contrib

    @pl.when(k != 0)
    def _():
        hid_ref[sl, :] = hid_ref[sl, :] + contrib


def norm_backpack_forward(input_ids, base_senses, contextualization,
                          eps_table, selector_table, change_vecs_table,
                          *, row_block=256, modification_dtype=jnp.bfloat16):
    """apply_modification=True, train_senses_low=True path of NormBackpack.forward."""
    bs, seqlen = input_ids.shape
    _, num_senses, _, n_embd = base_senses.shape
    assert change_vecs_table.shape[-1] == num_senses * n_embd

    assert n_embd % 128 == 0, "n_embd must be lane-aligned (multiple of 128)"
    assert seqlen % 8 == 0, "seqlen must be sublane-aligned (multiple of 8)"
    row_block = min(row_block, seqlen)
    assert seqlen % row_block == 0 and row_block % 8 == 0

    # ---- glue: nn.Embedding lookups (plain JAX gathers). The selector mask is
    # applied inside the kernel, so no masked (bs, seq, ns*d) intermediate hits
    # HBM; only the tiny epsilon/selector tensors (bs*seq*ns) are transposed.
    eps = jnp.take(eps_table, input_ids, axis=0)                       # (bs, seq, ns)
    sel = jnp.take(selector_table, input_ids, axis=0)                  # (bs, seq, ns)
    upd = jnp.take(change_vecs_table, input_ids, axis=0).astype(jnp.float32)  # (bs, seq, ns*d)
    eps_t = jnp.transpose(eps, (0, 2, 1))[..., None].astype(jnp.float32)      # (bs, ns, seq, 1)
    sel_t = jnp.transpose(sel, (0, 2, 1))[..., None].astype(jnp.float32)      # (bs, ns, seq, 1)

    # bf16 contextualization for the MXU: halves the largest HBM read stream
    # and the ctx double-buffer VMEM, removes the in-kernel cast.
    ctx_bf16 = contextualization.astype(jnp.bfloat16)

    n_q = seqlen // row_block
    grid = (bs, num_senses, n_q)

    # Inputs
    upd_spec = pl.BlockSpec((None, seqlen, n_embd),
                            lambda b, k, q: (b, 0, k))         # lane-slice sense k
    base_spec = pl.BlockSpec((None, None, seqlen, n_embd),
                             lambda b, k, q: (b, k, 0, 0))
    eps_spec = pl.BlockSpec((None, None, seqlen, 1),
                            lambda b, k, q: (b, k, 0, 0))
    sel_spec = pl.BlockSpec((None, None, seqlen, 1),
                            lambda b, k, q: (b, k, 0, 0))
    ctx_spec = pl.BlockSpec((None, None, row_block, seqlen),
                            lambda b, k, q: (b, k, q, 0))
    # Outputs
    hid_spec = pl.BlockSpec((None, seqlen, n_embd),
                            lambda b, k, q: (b, 0, 0))          # resident across (k, q)
    sout_spec = pl.BlockSpec((None, None, seqlen, n_embd),
                             lambda b, k, q: (b, k, 0, 0))      # resident across q

    out_shapes = (
        jax.ShapeDtypeStruct((bs, seqlen, n_embd), jnp.float32),               # hidden
        jax.ShapeDtypeStruct((bs, num_senses, seqlen, n_embd), jnp.float32),   # senses
        jax.ShapeDtypeStruct((bs, num_senses, seqlen, n_embd),
                             modification_dtype),                              # modification
    )

    # VMEM estimate (double-buffered inputs + resident outputs + scratch) used
    # to raise the scoped limit with a generation-aware ceiling.
    f32, bf16 = 4, 2
    mod_bytes = jnp.dtype(modification_dtype).itemsize
    est = (2 * (row_block * seqlen * bf16              # ctx blocks (bf16)
                + 2 * seqlen * n_embd * f32            # base + raw-update blocks
                + 2 * seqlen * f32)                    # eps + sel
           + 2 * seqlen * n_embd * (2 * f32 + mod_bytes)  # hid + senses + mod out blocks
           + seqlen * n_embd * bf16)                   # bf16 RHS scratch
    try:
        phys_vmem = int(getattr(pltpu.get_tpu_info(), "vmem_capacity_bytes",
                                128 << 20))
    except Exception:
        phys_vmem = 128 << 20
    # v7x (64 MiB physical) -> leave headroom for compiler scratch; v5e/v6e
    # (128 MiB) -> allow larger configs.
    cap = (48 << 20) if phys_vmem <= (64 << 20) else (100 << 20)
    vmem_limit = int(min(max(est + (4 << 20), 32 << 20), cap))

    # Advisory scheduler hint so XLA overlaps the wrapper gathers/cast nicely.
    flops = 2 * bs * num_senses * seqlen * seqlen * n_embd
    bytes_accessed = (
        bs * num_senses * seqlen * seqlen * bf16            # ctx read (bf16)
        + bs * num_senses * seqlen * n_embd * f32           # base senses read
        + bs * seqlen * num_senses * n_embd * f32           # raw updates read
        + 2 * bs * num_senses * seqlen * f32                # eps + sel reads
        + bs * seqlen * n_embd * f32                        # hidden write
        + bs * num_senses * seqlen * n_embd * f32           # senses write
        + bs * num_senses * seqlen * n_embd * mod_bytes)    # modification write
    cost = pl.CostEstimate(flops=flops, transcendentals=0,
                           bytes_accessed=bytes_accessed)

    kernel = functools.partial(_norm_backpack_kernel, row_block=row_block)

    hidden, senses_out, modification = pl.pallas_call(
        kernel,
        grid_spec=pltpu.PrefetchScalarGridSpec(
            num_scalar_prefetch=0,
            grid=grid,
            in_specs=[upd_spec, base_spec, eps_spec, sel_spec, ctx_spec],
            out_specs=[hid_spec, sout_spec, sout_spec],
            scratch_shapes=[pltpu.VMEM((seqlen, n_embd), jnp.bfloat16)],
        ),
        out_shape=out_shapes,
        compiler_params=pltpu.CompilerParams(
            dimension_semantics=("parallel", "arbitrary", "arbitrary"),
            vmem_limit_bytes=vmem_limit),
        cost_estimate=cost,
    )(upd, base_senses, eps_t, sel_t, ctx_bf16)

    # mirrors BackpackGPT2BaseModelOutput fields
    return hidden, contextualization, senses_out, modification


if __name__ == "__main__":
    key = jax.random.PRNGKey(0)
    bs, seqlen, num_senses, n_embd, vocab = 2, 256, 4, 128, 64
    k1, k2, k3, k4, k5, k6 = jax.random.split(key, 6)

    input_ids = jax.random.randint(k1, (bs, seqlen), 0, vocab, dtype=jnp.int32)
    # Precomputed backpack outputs (stand-ins for sense_network / sense_weight_net):
    base_senses = jax.random.normal(k2, (bs, num_senses, seqlen, n_embd), jnp.float32)
    contextualization = 0.1 * jax.random.normal(
        k3, (bs, num_senses, seqlen, seqlen), jnp.float32)

    # Parameter tables (shapes from __init__; values non-trivial so the
    # where/add/scale paths are all exercised):
    eps_table = 1.0 + 0.1 * jax.random.normal(k6, (vocab, num_senses), jnp.float32)
    selector_table = (jax.random.uniform(k5, (vocab, num_senses)) > 0.5).astype(jnp.float32)
    change_vecs_table = 0.01 * jax.random.normal(
        k4, (vocab, num_senses * n_embd), jnp.float32)

    outs = norm_backpack_forward(input_ids, base_senses, contextualization,
                                 eps_table, selector_table, change_vecs_table)
    hidden, ctx_out, senses_out, modification = jax.block_until_ready(outs)

    # ---- pure-JAX reference check ----
    eps_r = jnp.transpose(jnp.take(eps_table, input_ids, axis=0), (0, 2, 1))[..., None]
    sel_r = jnp.transpose(jnp.take(selector_table, input_ids, axis=0), (0, 2, 1))[..., None]
    upd_r = jnp.transpose(
        jnp.take(change_vecs_table, input_ids, axis=0)
        .reshape(bs, seqlen, num_senses, n_embd), (0, 2, 1, 3))
    mod_r = jnp.where(sel_r != 0.0, upd_r, jnp.zeros_like(upd_r))
    senses_r = (base_senses + mod_r) * eps_r
    hid_r = jnp.sum(
        jnp.einsum('bkij,bkjd->bkid', contextualization, senses_r,
                   preferred_element_type=jnp.float32), axis=1)

    # modification is emitted in bf16 -> bf16-level tolerance.
    assert jnp.allclose(modification.astype(jnp.float32), mod_r,
                        atol=1e-6, rtol=1e-2), "modification mismatch"
    assert jnp.allclose(senses_out, senses_r, atol=1e-5, rtol=1e-5), "senses mismatch"
    # bf16 MXU operands with f32 accumulate -> looser tolerance on hidden_states.
    assert jnp.allclose(hidden, hid_r, atol=3e-2, rtol=2e-2), "hidden_states mismatch"

    print("KERNEL_OK")
</pallas_src>

<mosaic_0001>
module attributes {stable_mosaic.version = 11 : i64} {
  func.func @_norm_backpack_kernel(%arg0: i32, %arg1: i32, %arg2: i32, %arg3: memref<1x256x128xf32, #tpu.memory_space<vmem>>, %arg4: memref<1x1x256x128xf32, #tpu.memory_space<vmem>>, %arg5: memref<1x1x256x1xf32, #tpu.memory_space<vmem>>, %arg6: memref<1x1x256x1xf32, #tpu.memory_space<vmem>>, %arg7: memref<1x1x256x256xbf16, #tpu.memory_space<vmem>>, %arg8: memref<1x256x128xf32, #tpu.memory_space<vmem>>, %arg9: memref<1x1x256x128xf32, #tpu.memory_space<vmem>>, %arg10: memref<1x1x256x128xbf16, #tpu.memory_space<vmem>>, %arg11: memref<256x128xbf16, #tpu.memory_space<vmem>>) attributes {dimension_semantics = [#tpu.dimension_semantics<parallel>, #tpu.dimension_semantics<arbitrary>, #tpu.dimension_semantics<arbitrary>], iteration_bounds = array<i64: 2, 4, 1>, scalar_prefetch = 0 : i64, scratch_operands = 1 : i64, tpu.core_type = #tpu.core_type<tc>, window_params = [{transform_indices = @transform_0, window_bounds = array<i64: 1, 256, 128>}, {transform_indices = @transform_1, window_bounds = array<i64: 1, 1, 256, 128>}, {transform_indices = @transform_2, window_bounds = array<i64: 1, 1, 256, 1>}, {transform_indices = @transform_3, window_bounds = array<i64: 1, 1, 256, 1>}, {transform_indices = @transform_4, window_bounds = array<i64: 1, 1, 256, 256>}, {transform_indices = @transform_5, window_bounds = array<i64: 1, 256, 128>}, {transform_indices = @transform_6, window_bounds = array<i64: 1, 1, 256, 128>}, {transform_indices = @transform_7, window_bounds = array<i64: 1, 1, 256, 128>}]} {
    %c0_i32 = arith.constant 0 : i32
    %0 = arith.cmpi eq, %arg2, %c0_i32 : i32
    %1 = arith.extui %0 : i1 to i32
    %c0_i32_0 = arith.constant 0 : i32
    %2 = arith.cmpi ne, %1, %c0_i32_0 : i32
    scf.if %2 {
      %c0_10 = arith.constant 0 : index
      %c0_11 = arith.constant 0 : index
      %c0_12 = arith.constant 0 : index
      %c0_13 = arith.constant 0 : index
      %15 = vector.load %arg6[%c0_10, %c0_11, %c0_12, %c0_13] : memref<1x1x256x1xf32, #tpu.memory_space<vmem>>, vector<1x1x256x1xf32>
      %16 = vector.shape_cast %15 : vector<1x1x256x1xf32> to vector<256x1xf32>
      %cst_14 = arith.constant 0.000000e+00 : f32
      %17 = vector.broadcast %cst_14 : f32 to vector<256x1xf32>
      %18 = arith.cmpf one, %16, %17 : vector<256x1xf32>
      %c0_15 = arith.constant 0 : index
      %c0_16 = arith.constant 0 : index
      %c0_17 = arith.constant 0 : index
      %19 = vector.load %arg3[%c0_15, %c0_16, %c0_17] : memref<1x256x128xf32, #tpu.memory_space<vmem>>, vector<1x256x128xf32>
      %20 = vector.shape_cast %19 : vector<1x256x128xf32> to vector<256x128xf32>
      %cst_18 = arith.constant 0.000000e+00 : f32
      %21 = vector.shape_cast %18 : vector<256x1xi1> to vector<256x1xi1>
      %22 = vector.broadcast %21 : vector<256x1xi1> to vector<256x128xi1>
      %23 = vector.broadcast %cst_18 : f32 to vector<256x128xf32>
      %24 = arith.select %22, %20, %23 : vector<256x128xi1>, vector<256x128xf32>
      %c0_19 = arith.constant 0 : index
      %c0_20 = arith.constant 0 : index
      %c0_21 = arith.constant 0 : index
      %c0_22 = arith.constant 0 : index
      %25 = vector.load %arg4[%c0_19, %c0_20, %c0_21, %c0_22] : memref<1x1x256x128xf32, #tpu.memory_space<vmem>>, vector<1x1x256x128xf32>
      %26 = vector.shape_cast %25 : vector<1x1x256x128xf32> to vector<256x128xf32>
      %27 = arith.addf %26, %24 : vector<256x128xf32>
      %c0_23 = arith.constant 0 : index
      %c0_24 = arith.constant 0 : index
      %c0_25 = arith.constant 0 : index
      %c0_26 = arith.constant 0 : index
      %28 = vector.load %arg5[%c0_23, %c0_24, %c0_25, %c0_26] : memref<1x1x256x1xf32, #tpu.memory_space<vmem>>, vector<1x1x256x1xf32>
      %29 = vector.shape_cast %28 : vector<1x1x256x1xf32> to vector<256x1xf32>
      %30 = vector.broadcast %29 : vector<256x1xf32> to vector<256x128xf32>
      %31 = arith.mulf %27, %30 : vector<256x128xf32>
      %32 = arith.truncf %24 : vector<256x128xf32> to vector<256x128xbf16>
      %c0_27 = arith.constant 0 : index
      %c0_28 = arith.constant 0 : index
      %c0_29 = arith.constant 0 : index
      %c0_30 = arith.constant 0 : index
      %33 = vector.load %arg10[%c0_27, %c0_28, %c0_29, %c0_30] : memref<1x1x256x128xbf16, #tpu.memory_space<vmem>>, vector<1x1x256x128xbf16>
      %34 = vector.shape_cast %33 : vector<1x1x256x128xbf16> to vector<256x128xbf16>
      %35 = vector.shape_cast %32 : vector<256x128xbf16> to vector<1x1x256x128xbf16>
      tpu.vector_store %arg10[%c0_27, %c0_28, %c0_29, %c0_30], %35 {strides = array<i32>} : memref<1x1x256x128xbf16, #tpu.memory_space<vmem>>, vector<1x1x256x128xbf16>,
      %c0_31 = arith.constant 0 : index
      %c0_32 = arith.constant 0 : index
      %c0_33 = arith.constant 0 : index
      %c0_34 = arith.constant 0 : index
      %36 = vector.load %arg9[%c0_31, %c0_32, %c0_33, %c0_34] : memref<1x1x256x128xf32, #tpu.memory_space<vmem>>, vector<1x1x256x128xf32>
      %37 = vector.shape_cast %36 : vector<1x1x256x128xf32> to vector<256x128xf32>
      %38 = vector.shape_cast %31 : vector<256x128xf32> to vector<1x1x256x128xf32>
      tpu.vector_store %arg9[%c0_31, %c0_32, %c0_33, %c0_34], %38 {strides = array<i32>} : memref<1x1x256x128xf32, #tpu.memory_space<vmem>>, vector<1x1x256x128xf32>,
      %39 = arith.truncf %31 : vector<256x128xf32> to vector<256x128xbf16>
      %c0_35 = arith.constant 0 : index
      %c0_36 = arith.constant 0 : index
      %40 = vector.load %arg11[%c0_35, %c0_36] : memref<256x128xbf16, #tpu.memory_space<vmem>>, vector<256x128xbf16>
      tpu.vector_store %arg11[%c0_35, %c0_36], %39 {strides = array<i32>} : memref<256x128xbf16, #tpu.memory_space<vmem>>, vector<256x128xbf16>,
    } else {
    }
    %c0 = arith.constant 0 : index
    %c0_1 = arith.constant 0 : index
    %c0_2 = arith.constant 0 : index
    %c0_3 = arith.constant 0 : index
    %3 = vector.load %arg7[%c0, %c0_1, %c0_2, %c0_3] : memref<1x1x256x256xbf16, #tpu.memory_space<vmem>>, vector<1x1x256x256xbf16>
    %4 = vector.shape_cast %3 : vector<1x1x256x256xbf16> to vector<256x256xbf16>
    %c0_4 = arith.constant 0 : index
    %c0_5 = arith.constant 0 : index
    %5 = vector.load %arg11[%c0_4, %c0_5] : memref<256x128xbf16, #tpu.memory_space<vmem>>, vector<256x128xbf16>
    %cst = arith.constant dense<0.000000e+00> : vector<256x128xf32>
    %6 = tpu.matmul %4, %5, %cst {dimension_numbers = #tpu.dot_dimension_numbers<[1], [0], [0], [1], [0, 0, 1, 1], [], []>} : vector<256x256xbf16>, vector<256x128xbf16>, vector<256x128xf32> -> vector<256x128xf32>
    %c256_i32 = arith.constant 256 : i32
    %7 = arith.muli %arg2, %c256_i32 : i32
    %8 = tpu.assume_multiple %7, 256 : i32
    %c0_i32_6 = arith.constant 0 : i32
    %9 = arith.cmpi eq, %arg1, %c0_i32_6 : i32
    %10 = arith.extui %9 : i1 to i32
    %c0_i32_7 = arith.constant 0 : i32
    %11 = arith.cmpi ne, %10, %c0_i32_7 : i32
    scf.if %11 {
      %c0_10 = arith.constant 0 : index
      %15 = arith.index_cast %8 : i32 to index
      %c0_11 = arith.constant 0 : index
      %16 = vector.load %arg8[%c0_10, %15, %c0_11] : memref<1x256x128xf32, #tpu.memory_space<vmem>>, vector<1x256x128xf32>
      %17 = vector.shape_cast %16 : vector<1x256x128xf32> to vector<256x128xf32>
      %18 = vector.shape_cast %6 : vector<256x128xf32> to vector<1x256x128xf32>
      tpu.vector_store %arg8[%c0_10, %15, %c0_11], %18 {strides = array<i32>} : memref<1x256x128xf32, #tpu.memory_space<vmem>>, vector<1x256x128xf32>,
    } else {
    }
    %c0_i32_8 = arith.constant 0 : i32
    %12 = arith.cmpi ne, %arg1, %c0_i32_8 : i32
    %13 = arith.extui %12 : i1 to i32
    %c0_i32_9 = arith.constant 0 : i32
    %14 = arith.cmpi ne, %13, %c0_i32_9 : i32
    scf.if %14 {
      %c0_10 = arith.constant 0 : index
      %15 = arith.index_cast %8 : i32 to index
      %c0_11 = arith.constant 0 : index
      %16 = vector.load %arg8[%c0_10, %15, %c0_11] : memref<1x256x128xf32, #tpu.memory_space<vmem>>, vector<1x256x128xf32>
      %17 = vector.shape_cast %16 : vector<1x256x128xf32> to vector<256x128xf32>
      %18 = arith.addf %17, %6 : vector<256x128xf32>
      %c0_12 = arith.constant 0 : index
      %19 = arith.index_cast %8 : i32 to index
      %c0_13 = arith.constant 0 : index
      %20 = vector.load %arg8[%c0_12, %19, %c0_13] : memref<1x256x128xf32, #tpu.memory_space<vmem>>, vector<1x256x128xf32>
      %21 = vector.shape_cast %20 : vector<1x256x128xf32> to vector<256x128xf32>
      %22 = vector.shape_cast %18 : vector<256x128xf32> to vector<1x256x128xf32>
      tpu.vector_store %arg8[%c0_12, %19, %c0_13], %22 {strides = array<i32>} : memref<1x256x128xf32, #tpu.memory_space<vmem>>, vector<1x256x128xf32>,
    } else {
    }
    return
  }
  func.func @transform_0(%arg0: i32, %arg1: i32, %arg2: i32) -> (i32, i32, i32) {
    %c0_i32 = arith.constant 0 : i32
    %c0_i32_0 = arith.constant 0 : i32
    return %arg0, %c0_i32, %arg1 : i32, i32, i32
  }
  func.func @transform_1(%arg0: i32, %arg1: i32, %arg2: i32) -> (i32, i32, i32, i32) {
    %c0_i32 = arith.constant 0 : i32
    %c0_i32_0 = arith.constant 0 : i32
    %c0_i32_1 = arith.constant 0 : i32
    return %arg0, %arg1, %c0_i32, %c0_i32_0 : i32, i32, i32, i32
  }
  func.func @transform_2(%arg0: i32, %arg1: i32, %arg2: i32) -> (i32, i32, i32, i32) {
    %c0_i32 = arith.constant 0 : i32
    %c0_i32_0 = arith.constant 0 : i32
    %c0_i32_1 = arith.constant 0 : i32
    return %arg0, %arg1, %c0_i32, %c0_i32_0 : i32, i32, i32, i32
  }
  func.func @transform_3(%arg0: i32, %arg1: i32, %arg2: i32) -> (i32, i32, i32, i32) {
    %c0_i32 = arith.constant 0 : i32
    %c0_i32_0 = arith.constant 0 : i32
    %c0_i32_1 = arith.constant 0 : i32
    return %arg0, %arg1, %c0_i32, %c0_i32_0 : i32, i32, i32, i32
  }
  func.func @transform_4(%arg0: i32, %arg1: i32, %arg2: i32) -> (i32, i32, i32, i32) {
    %c0_i32 = arith.constant 0 : i32
    %c0_i32_0 = arith.constant 0 : i32
    return %arg0, %arg1, %arg2, %c0_i32 : i32, i32, i32, i32
  }
  func.func @transform_5(%arg0: i32, %arg1: i32, %arg2: i32) -> (i32, i32, i32) {
    %c0_i32 = arith.constant 0 : i32
    %c0_i32_0 = arith.constant 0 : i32
    %c0_i32_1 = arith.constant 0 : i32
    return %arg0, %c0_i32, %c0_i32_0 : i32, i32, i32
  }
  func.func @transform_6(%arg0: i32, %arg1: i32, %arg2: i32) -> (i32, i32, i32, i32) {
    %c0_i32 = arith.constant 0 : i32
    %c0_i32_0 = arith.constant 0 : i32
    %c0_i32_1 = arith.constant 0 : i32
    return %arg0, %arg1, %c0_i32, %c0_i32_0 : i32, i32, i32, i32
  }
  func.func @transform_7(%arg0: i32, %arg1: i32, %arg2: i32) -> (i32, i32, i32, i32) {
    %c0_i32 = arith.constant 0 : i32
    %c0_i32_0 = arith.constant 0 : i32
    %c0_i32_1 = arith.constant 0 : i32
    return %arg0, %arg1, %c0_i32, %c0_i32_0 : i32, i32, i32, i32
  }
}

</mosaic_0001>

<bundles_post_ra>
// kernel: tpu_custom_call.1
= control target key start
LH: loop header
LB: loop body
LE: loop exit
PB: predicated region body
PF: predicated region fallthrough
CT: control target
= control target key end

     0   :  { %s4167_s0 = inlined_call_operand.vmem [shape: f32[2,256,512], index: 0, kind: input, shape index: {}]   ;;  %s4168_s1 = inlined_call_operand.vmem [shape: f32[2,4,256,128], index: 1, kind: input, shape index: {}]   ;;  %s4169_s2 = inlined_call_operand.vmem [shape: f32[2,4,256,1], index: 2, kind: input, shape index: {}]   ;;  %s4170_s3 = inlined_call_operand.vmem [shape: f32[2,4,256,1], index: 3, kind: input, shape index: {}]   ;;  %s4171_s4 = inlined_call_operand.hbm [shape: bf16[2,4,256,256], index: 4, kind: input, shape index: {}]   ;;  %s4172_s5 = inlined_call_operand.hbm [shape: f32[2,256,128], index: 5, kind: output, shape index: {0}]   ;;  %s4173_s6 = inlined_call_operand.hbm [shape: f32[2,4,256,128], index: 6, kind: output, shape index: {1}]   ;;  %s4174_s7 = inlined_call_operand.hbm [shape: bf16[2,4,256,128], index: 7, kind: output, shape index: {2}]  }
   0x1   :  { %4188 = sst [smem:[#allocation23_spill]] %s4167_s0 }
   0x2   :  { %4189 = sst [smem:[#allocation24_spill]] %s4168_s1 }
   0x3   :  { %4190 = sst [smem:[#allocation25_spill]] %s4169_s2 }
   0x4   :  { %4191 = sst [smem:[#allocation26_spill]] %s4170_s3 }
   0x5   :  { %4192 = sst [smem:[#allocation27_spill]] %s4171_s4 }
   0x6   :  { %4193 = sst [smem:[#allocation28_spill]] %s4172_s5 }
   0x7   :  { %4194 = sst [smem:[#allocation29_spill]] %s4173_s6 }
   0x8   :  { %4195 = sst [smem:[#allocation30_spill]] %s4174_s7 }
   0x9   :  { %13 = vsyncpa [#allocation5], 0 }
   0xa   :  { %15 = vsyncpa [#allocation5 + $0x1], 0 }
   0xb   :  { %16 = vsyncpa [#allocation6], 0 }
   0xc   :  { %18 = vsyncpa [#allocation6 + $0x1], 0 }
   0xd   :  { %19 = vsyncpa [#allocation9], 0 }
   0xe   :  { %21 = vsyncpa [#allocation9 + $0x1], 0  ;;  %s3188_s24 = smov 0   ;;  %s3190_s25 = smov 0  }
   0xf   :  { %s3192_s26 = smov 0   ;;  %s3194_s27 = smov 0  }
  0x10   :  { %s3196_s28 = smov 0   ;;  %s3198_s29 = smov 0  }
  0x11   :  { %s3200_s30 = smov 0   ;;  %s3202_s8 = smov 0  }
  0x12   :  { %s3204_s9 = smov 0   ;;  %s3206_s10 = smov 0  }
  0x13   :  { %s3208_s11 = smov 0  }
  0x14 LB: > { %4196 = sst [smem:[#allocation14_spill]] %s3099_s24  ;;  %s3244_s12 = sadd.s32 4294967295, %s3139_s11   ;;  %s3139_s11 = sphi %s3208_s11, %s27_s11   ;;  %s3135_s10 = sphi %s3206_s10, %s4241_s10   ;;  %s3131_s9 = sphi %s3204_s9, %s4240_s9   ;;  %s3127_s8 = sphi %s3202_s8, %s4239_s8   ;;  %s3123_s30 = sphi %s3200_s30, %s4238_s30   ;;  %s3119_s29 = sphi %s3198_s29, %s4237_s29   ;;  %s3115_s28 = sphi %s3196_s28, %s4236_s28   ;;  %s3111_s27 = sphi %s3194_s27, %s4235_s27   ;;  %s3107_s26 = sphi %s3192_s26, %s4229_s26   ;;  %s3103_s25 = sphi %s3190_s25, %s4234_s25   ;;  %s3099_s24 = sphi %s3188_s24, %s4233_s24  }
  0x15   : > { %4197 = sst [smem:[#allocation15_spill]] %s3107_s26  ;;  %s42_s14 = sadd.s32 1, %s3131_s9 }
  0x16   : > { %s46_s15 = sadd.s32 1, %s3135_s10  ;;  %p44_p0 = scmp.ge.s32.totalorder %s42_s14, 4 }
  0x17   : > { %s55_s16 = sadd.s32 1, %s3119_s29  ;;  %p62_p1 = scmp.ne.s32.totalorder %s3119_s29, %s3115_s28 }
  0x18   : > { %p63_p2 = scmp.eq.s32.totalorder %s3139_s11, 0  ;;  %s4243_s14 = smov (%p44_p0, %s42_s14), 0 }
  0x19   : > { %4198 = sst [smem:[#allocation16_spill]] %s4243_s14  ;;  %s4245_s15 = smov (!%p44_p0, %s46_s15), %s3135_s10 }
  0x1a   : > { %s51_s17 = ssub.s32 %s3131_s9, %s4243_s14  ;;  %p3261_p3 = por %p63_p2, %p62_p1 }
  0x1b   : > { %p48_p4 = scmp.ge.s32.totalorder %s4245_s15, 2  ;;  %p182_p5 = scmp.ne.s32.totalorder %s3115_s28, %s3111_s27 }
  0x1c   : > { %p183_p6 = scmp.eq.s32.totalorder %s3244_s12, 0  ;;  %s195_s19 = sadd.s32 1, %s3107_s26 }
  0x1d   : > { %s4247_s15 = smov (%p48_p4, %s4245_s15), 0  ;;  %p205_p8 = scmp.ne.s32.totalorder %s3107_s26, %s3103_s25 }
  0x1e   : > { %4200 = sst [smem:[#allocation17_spill]] %s4247_s15  ;;  %p3274_p7 = por %p183_p6, %p182_p5 }
  0x1f   : > { %s50_s21 = ssub.s32 %s3135_s10, %s4247_s15  ;;  %p206_p9 = scmp.eq.s32.totalorder %s3244_s12, 7 }
  0x20   : > { %s52_s22 = sor.u32 %s51_s17, %s50_s21  ;;  %p193_p10 = scmp.eq.s32.totalorder %s50_s21, 0 }
  0x21   : > { %p53_p11 = scmp.eq.s32.totalorder %s52_s22, 0  ;;  %p3283_p12 = por %p206_p9, %p205_p8 }
  0x22   : > { %s3288_s13 = scalar_select %p193_p10, %s3107_s26, %s195_s19  }
  0x23   : > { %s4202_s23 = scalar_select %p3283_p12, 1, 0 }
  0x24   : > { %4204 = sst [smem:[#allocation19_spill]] %s3288_s13  ;;  %p211_p13 = scmp.ne.s32.totalorder %s3103_s25, %s3099_s24 }
  0x25   : > { %4203 = sst [smem:[#allocation18_spill]] %s4202_s23  ;;  %s4206_s5 = sadd.s32 4294967294, %s3139_s11  }
  0x26   : > { %s3291_s14 = scalar_select %p53_p11, %s3119_s29, %s55_s16  }
  0x27   : > { %p212_p0 = scmp.eq.s32.totalorder %s4206_s5, 7  ;;  %p3300_p2 = por %p206_p9, %p62_p1 }
  0x28   : > { %4205 = sst [smem:[#allocation20_spill]] %s3291_s14  ;;  %p2327_p8 = scmp.ge.s32.totalorder %s3139_s11, 8 }
  0x29   : > { %p3304_p4 = por %p212_p0, %p211_p13  ;;  %p3311_p6 = por %p212_p0, %p182_p5 }
  0x2a   : > { %284 = sbr.rel (%p2327_p8) target bundleno = 102 (0x66), region = 16 }
  0x2b   : > { %s4208_s17 = scalar_select %p3304_p4, 1, 0 }
  0x2c   : > { %s4210_s21 = scalar_select %p3311_p6, 1, 0 }
  0x2d   : > { %4209 = sst [smem:[#allocation21_spill]] %s4208_s17 }
  0x2e   : > { %4211 = sst [smem:[#allocation22_spill]] %s4210_s21 }
  0x2f   : > { %287 = sbr.rel (!%p3261_p3) target bundleno = 89 (0x59), region = 20  ;;  %s289_s5 = sand.u32 (%p3261_p3), 1, %s3119_s29  }
  0x30   : > { %s2329_s16 = sshll.u32 (%p3261_p3), %s3135_s10, 7  ;;  %s2328_s19 = sshll.u32 (%p3261_p3), %s289_s5, 8 }
  0x31   : > { %s293_s22 = sadd.s32 (%p3261_p3), %s3131_s9, %s2329_s16  ;;  %s4212_s0 = sld [smem:[#allocation23_spill]] (%p3261_p3) }
  0x32   : > { %s2330_s15 = sshll.u32 (%p3261_p3), %s293_s22, 3  ;;  %s3329_s5 = scalar_lea.vmem (%p3261_p3), [#allocation3], %s2328_s19 }
  0x37   : > { %s3324_s13 = scalar_lea.vmem %s4212_s0, %s2330_s15 }
  0x38   : > { %v386_v0 = vld [vmem:[%s3324_s13] sm:$0xff] }
  0x39   : > { %v388_v1 = vld [vmem:[%s3324_s13 + $0x20] sm:$0xff]  ;;  %387 = vst [vmem:[%s3329_s5] sm:$0xff] %v386_v0 }
  0x3a   : > { %v390_v2 = vld [vmem:[%s3324_s13 + $0x40] sm:$0xff]  ;;  %389 = vst [vmem:[%s3329_s5 + $0x8] sm:$0xff] %v388_v1 }
  0x3b   : > { %v392_v3 = vld [vmem:[%s3324_s13 + $0x60] sm:$0xff]  ;;  %391 = vst [vmem:[%s3329_s5 + $0x10] sm:$0xff] %v390_v2 }
  0x3c   : > { %v394_v4 = vld [vmem:[%s3324_s13 + $0x80] sm:$0xff]  ;;  %393 = vst [vmem:[%s3329_s5 + $0x18] sm:$0xff] %v392_v3 }
  0x3d   : > { %v396_v5 = vld [vmem:[%s3324_s13 + $0xa0] sm:$0xff]  ;;  %395 = vst [vmem:[%s3329_s5 + $0x20] sm:$0xff] %v394_v4 }
  0x3e   : > { %v398_v6 = vld [vmem:[%s3324_s13 + $0xc0] sm:$0xff]  ;;  %397 = vst [vmem:[%s3329_s5 + $0x28] sm:$0xff] %v396_v5 }
  0x3f   : > { %v400_v7 = vld [vmem:[%s3324_s13 + $0xe0] sm:$0xff]  ;;  %399 = vst [vmem:[%s3329_s5 + $0x30] sm:$0xff] %v398_v6 }
  0x40   : > { %v402_v8 = vld [vmem:[%s3324_s13 + $0x100] sm:$0xff]  ;;  %401 = vst [vmem:[%s3329_s5 + $0x38] sm:$0xff] %v400_v7 }
  0x41   : > { %v404_v9 = vld [vmem:[%s3324_s13 + $0x120] sm:$0xff]  ;;  %403 = vst [vmem:[%s3329_s5 + $0x40] sm:$0xff] %v402_v8 }
  0x42   : > { %v406_v10 = vld [vmem:[%s3324_s13 + $0x140] sm:$0xff]  ;;  %405 = vst [vmem:[%s3329_s5 + $0x48] sm:$0xff] %v404_v9 }
  0x43   : > { %v408_v11 = vld [vmem:[%s3324_s13 + $0x160] sm:$0xff]  ;;  %407 = vst [vmem:[%s3329_s5 + $0x50] sm:$0xff] %v406_v10 }
  0x44   : > { %v410_v12 = vld [vmem:[%s3324_s13 + $0x180] sm:$0xff]  ;;  %409 = vst [vmem:[%s3329_s5 + $0x58] sm:$0xff] %v408_v11 }
  0x45   : > { %v412_v13 = vld [vmem:[%s3324_s13 + $0x1a0] sm:$0xff]  ;;  %411 = vst [vmem:[%s3329_s5 + $0x60] sm:$0xff] %v410_v12 }
  0x46   : > { %v414_v14 = vld [vmem:[%s3324_s13 + $0x1c0] sm:$0xff]  ;;  %413 = vst [vmem:[%s3329_s5 + $0x68] sm:$0xff] %v412_v13 }
  0x47   : > { %v416_v15 = vld [vmem:[%s3324_s13 + $0x1e0] sm:$0xff]  ;;  %415 = vst [vmem:[%s3329_s5 + $0x70] sm:$0xff] %v414_v14 }
  0x48   : > { %v418_v16 = vld [vmem:[%s3324_s13 + $0x200] sm:$0xff]  ;;  %417 = vst [vmem:[%s3329_s5 + $0x78] sm:$0xff] %v416_v15 }
  0x49   : > { %v420_v17 = vld [vmem:[%s3324_s13 + $0x220] sm:$0xff]  ;;  %419 = vst [vmem:[%s3329_s5 + $0x80] sm:$0xff] %v418_v16 }
  0x4a   : > { %v422_v18 = vld [vmem:[%s3324_s13 + $0x240] sm:$0xff]  ;;  %421 = vst [vmem:[%s3329_s5 + $0x88] sm:$0xff] %v420_v17 }
  0x4b   : > { %v424_v19 = vld [vmem:[%s3324_s13 + $0x260] sm:$0xff]  ;;  %423 = vst [vmem:[%s3329_s5 + $0x90] sm:$0xff] %v422_v18 }
  0x4c   : > { %v426_v20 = vld [vmem:[%s3324_s13 + $0x280] sm:$0xff]  ;;  %425 = vst [vmem:[%s3329_s5 + $0x98] sm:$0xff] %v424_v19 }
  0x4d   : > { %v428_v21 = vld [vmem:[%s3324_s13 + $0x2a0] sm:$0xff]  ;;  %427 = vst [vmem:[%s3329_s5 + $0xa0] sm:$0xff] %v426_v20 }
  0x4e   : > { %v430_v22 = vld [vmem:[%s3324_s13 + $0x2c0] sm:$0xff]  ;;  %429 = vst [vmem:[%s3329_s5 + $0xa8] sm:$0xff] %v428_v21 }
  0x4f   : > { %v432_v23 = vld [vmem:[%s3324_s13 + $0x2e0] sm:$0xff]  ;;  %431 = vst [vmem:[%s3329_s5 + $0xb0] sm:$0xff] %v430_v22 }
  0x50   : > { %v434_v24 = vld [vmem:[%s3324_s13 + $0x300] sm:$0xff]  ;;  %433 = vst [vmem:[%s3329_s5 + $0xb8] sm:$0xff] %v432_v23 }
  0x51   : > { %v436_v25 = vld [vmem:[%s3324_s13 + $0x320] sm:$0xff]  ;;  %435 = vst [vmem:[%s3329_s5 + $0xc0] sm:$0xff] %v434_v24 }
  0x52   : > { %v438_v26 = vld [vmem:[%s3324_s13 + $0x340] sm:$0xff]  ;;  %437 = vst [vmem:[%s3329_s5 + $0xc8] sm:$0xff] %v436_v25 }
  0x53   : > { %v440_v27 = vld [vmem:[%s3324_s13 + $0x360] sm:$0xff]  ;;  %439 = vst [vmem:[%s3329_s5 + $0xd0] sm:$0xff] %v438_v26 }
  0x54   : > { %v442_v28 = vld [vmem:[%s3324_s13 + $0x380] sm:$0xff]  ;;  %441 = vst [vmem:[%s3329_s5 + $0xd8] sm:$0xff] %v440_v27 }
  0x55   : > { %v444_v29 = vld [vmem:[%s3324_s13 + $0x3a0] sm:$0xff]  ;;  %443 = vst [vmem:[%s3329_s5 + $0xe0] sm:$0xff] %v442_v28 }
  0x56   : > { %v446_v30 = vld [vmem:[%s3324_s13 + $0x3c0] sm:$0xff]  ;;  %445 = vst [vmem:[%s3329_s5 + $0xe8] sm:$0xff] %v444_v29 }
  0x57   : > { %v448_v31 = vld [vmem:[%s3324_s13 + $0x3e0] sm:$0xff]  ;;  %447 = vst [vmem:[%s3329_s5 + $0xf0] sm:$0xff] %v446_v30 }
  0x58   : > { %449 = vst [vmem:[%s3329_s5 + $0xf8] sm:$0xff] %v448_v31 }
  0x59 PF: > { %s492_s14 = sand.u32 1, %s3119_s29   ;;  %s2332_s15 = sshll.u32 %s3131_s9, 6 }
  0x5a   : > { %s2331_s16 = sshll.u32 %s492_s14, 8  ;;  %s2333_s19 = sshll.u32 %s3135_s10, 8 }
  0x5b   : > { %s504_s22 = sadd.s32 %s2333_s19, %s2332_s15  ;;  %s496_s27 = scalar_lea.vmem [#allocation4], %s2331_s16 }
  0x5c   : > { %s509_s0 = sshll.u32 %s496_s27, 4  ;;  %s2334_s26 = sshll.u32 %s504_s22, 2  ;;  %s510_s0 = int_to_ptr.vmem [resolvable:$true] %s509_s0 }
  0x5d   : > { %s4213_s4 = sld [smem:[#allocation27_spill]]  ;;  %s493_s5 = scalar_lea.sflag [#allocation5], %s492_s14 }
  0x5e   : > { %s3141_s23 = smov 128   ;;  %s3142_s6 = smov 8  }
  0x63   : > { %s506_s13 = scalar_lea.hbm %s4213_s4, %s2334_s26 }
  0x64   : > { %s507_s24 = sshll.u32 %s506_s13, 4  ;;  %s508_s24 = int_to_ptr.hbm [resolvable:$true] %s507_s24 }
  0x65   : > { %2812 = dma.hbm_to_vmem [thread:$0]  (%p3261_p3), %s508_s24, 4096, %s510_s0, %s493_s5, %s3141_s23, %s3141_s23, %s3142_s6  }
  0x66 PF: > { %p2335_p1 = scmp.ge.s32.totalorder %s3139_s11, 1  ;;  %p517_p5 = scmp.lt.s32.totalorder %s3139_s11, 9 }
  0x68   : > { %p518_p9 = pnand %p2335_p1, %p517_p5 }
  0x69   : > { %s3403_s15 = sand.u32 (!%p518_p9), 1, %s3115_s28  }
  0x6a   : > { %521 = sbr.rel (%p518_p9) target bundleno = 808 (0x328), region = 74  ;;  %s3406_s26 = sshll.u32 (!%p518_p9), %s3403_s15, 8 }
  0x6b   : > { %s3409_s17 = scalar_lea.vmem (!%p518_p9), [#allocation3], %s3406_s26  ;;  %s531_s0 = scalar_lea.sflag (!%p518_p9), [#allocation5], %s3403_s15 }
  0x6c   : > { %s3413_s6 = scalar_lea.vmem (!%p518_p9), [#allocation4], %s3406_s26 }
  0x6f   : > { %3086 = dma.done.wait (%p3274_p7), %s531_s0, 4096  }
  0x70   : > { %3088 = vsyncadd (%p3274_p7), %s531_s0, 4294963200  ;;  %p607_p3 = scmp.lt.s32.totalorder %s3127_s8, 1  ;;  %p609_p10 = scmp.lt.s32.totalorder %s3123_s30, 3  ;;  %v3143_v32 = vmov 0  }
  0x71   : > { %2928 = vset.pattern.permute.xlu2 %v3143_v32  ;;  %2927 = vset.pattern.permute.xlu1 %v3143_v32  ;;  %s4214_s3 = sld [smem:[#allocation26_spill]]  ;;  %s4186_s0 = sand.u32 1, %s3103_s25  }
  0x72   : > { %2926 = vset.pattern.permute.xlu0 %v3143_v32  ;;  %s608_s24 = scalar_select %p607_p3, %s3127_s8, 1 }
  0x73   : > { %s610_s18 = scalar_select %p609_p10, %s3123_s30, 3 }
  0x74   : > { %s2342_s23 = sshll.u32 %s608_s24, 7  ;;  %s4215_s2 = sld [smem:[#allocation25_spill]] }
  0x75   : > { %s2341_s21 = sshll.u32 %s610_s18, 5  ;;  %s3478_s24 = sshll.u32 %s4186_s0, 8 }
  0x76   : > { %s613_s14 = sadd.s32 %s2342_s23, %s2341_s21  ;;  %s2340_s18 = sshll.u32 %s3403_s15, 7 }
  0x77   : > { %s3426_s20 = sshll.u32 %s613_s14, 3  ;;  %s3522_s23 = scalar_lea.vmem [#allocation10], %s2340_s18 }
  0x78   : > { %s3432_s22 = scalar_lea.vmem %s4214_s3, %s3426_s20  ;;  %s4216_s1 = sld [smem:[#allocation24_spill]] }
  0x79   : > { %v643_v33 = vld [vmem:[%s3432_s22 + $0x20] sm:$0xff]  ;;  %v641_v34 = vld [vmem:[%s3432_s22 + $0x10] sm:$0xff]  ;;  %v644_v39 = vld [vmem:[%s3432_s22 + $0x28] sm:$0xff]  ;;  %p2542_p7 = scmp.ne.s32.totalorder %s3123_s30, 0 }
  0x7a   : > { %v639_v35 = vld [vmem:[%s3432_s22] sm:$0xff]  ;;  %vm675_vm0 = vcmp.ne.f32.partialorder %v643_v33, 0.0  ;;  %vm673_vm1 = vcmp.ne.f32.partialorder %v641_v34, 0.0  ;;  %v642_v40 = vld [vmem:[%s3432_s22 + $0x18] sm:$0xff]  ;;  %v640_v41 = vld [vmem:[%s3432_s22 + $0x8] sm:$0xff]  ;;  %vm676_vm3 = vcmp.ne.f32.partialorder %v644_v39, 0.0  ;;  %s3469_s5 = scalar_lea.vmem %s4215_s2, %s3426_s20 }
  0x7b   : > { %vm671_vm2 = vcmp.ne.f32.partialorder %v639_v35, 0.0  ;;  %v739_v36 = vsel %vm675_vm0, 1, %v3143_v32  ;;  %v737_v37 = vsel %vm673_vm1, 1, %v3143_v32  ;;  %vm674_vm4 = vcmp.ne.f32.partialorder %v642_v40, 0.0  ;;  %v653_v45 = vld [vmem:[%s3432_s22 + $0x70] sm:$0xff]  ;;  %v646_v46 = vld [vmem:[%s3432_s22 + $0x38] sm:$0xff] }
  0x7c   : > { %v735_v38 = vsel %vm671_vm2, 1, %v3143_v32  ;;  %780 = vperm.xlu2 %2928, %v739_v36   ;;  %774 = vperm.xlu1 %2927, %v737_v37   ;;  %vm672_vm5 = vcmp.ne.f32.partialorder %v640_v41, 0.0  ;;  %v740_v42 = vsel %vm676_vm3, 1, %v3143_v32  ;;  %v738_v43 = vsel %vm674_vm4, 1, %v3143_v32  ;;  %v645_v47 = vld [vmem:[%s3432_s22 + $0x30] sm:$0xff]  ;;  %v670_v51 = vld [vmem:[%s3432_s22 + $0xf8] sm:$0xff] }
  0x7d   : > { %768 = vperm.xlu0 %2926, %v735_v38   ;;  %v736_v44 = vsel %vm672_vm5, 1, %v3143_v32  ;;  %vm685_vm6 = vcmp.ne.f32.partialorder %v653_v45, 0.0  ;;  %vm678_vm7 = vcmp.ne.f32.partialorder %v646_v46, 0.0  ;;  %vm677_vm8 = vcmp.ne.f32.partialorder %v645_v47, 0.0  ;;  %v669_v52 = vld [vmem:[%s3432_s22 + $0xf0] sm:$0xff]  ;;  %v654_v53 = vld [vmem:[%s3432_s22 + $0x78] sm:$0xff] }
  0x7e   : > { %v749_v48 = vsel %vm685_vm6, 1, %v3143_v32  ;;  %v742_v49 = vsel %vm678_vm7, 1, %v3143_v32  ;;  %v741_v50 = vsel %vm677_vm8, 1, %v3143_v32  ;;  %vm702_vm9 = vcmp.ne.f32.partialorder %v670_v51, 0.0  ;;  %v667_v57 = vld [vmem:[%s3432_s22 + $0xe0] sm:$0xff]  ;;  %v652_v58 = vld [vmem:[%s3432_s22 + $0x68] sm:$0xff]  ;;  %s3587_s14 = scalar_lea.vmem %s4216_s1, %s3426_s20 }
  0x7f   : > { %vm701_vm10 = vcmp.ne.f32.partialorder %v669_v52, 0.0  ;;  %vm686_vm11 = vcmp.ne.f32.partialorder %v654_v53, 0.0  ;;  %v766_v54 = vsel %vm702_vm9, 1, %v3143_v32  ;;  %v651_v59 = vld [vmem:[%s3432_s22 + $0x60] sm:$0xff]  ;;  %vm699_vm12 = vcmp.ne.f32.partialorder %v667_v57, 0.0  ;;  %v668_v63 = vld [vmem:[%s3432_s22 + $0xe8] sm:$0xff] }
  0x80   : > { %v765_v55 = vsel %vm701_vm10, 1, %v3143_v32  ;;  %v750_v56 = vsel %vm686_vm11, 1, %v3143_v32  ;;  %vm684_vm13 = vcmp.ne.f32.partialorder %v652_v58, 0.0  ;;  %vm683_vm14 = vcmp.ne.f32.partialorder %v651_v59, 0.0  ;;  %v1006_v0 = vld [vmem:[%s3469_s5 + $0x78] sm:$0xff]  ;;  %v1005_v1 = vld [vmem:[%s3469_s5 + $0x70] sm:$0xff] }
  0x81   : > { %v763_v60 = vsel %vm699_vm12, 1, %v3143_v32  ;;  %v748_v61 = vsel %vm684_vm13, 1, %v3143_v32  ;;  %v747_v62 = vsel %vm683_vm14, 1, %v3143_v32  ;;  %vm700_vm15 = vcmp.ne.f32.partialorder %v668_v63, 0.0  ;;  %v649_v3 = vld [vmem:[%s3432_s22 + $0x50] sm:$0xff]  ;;  %v1022_v5 = vld [vmem:[%s3469_s5 + $0xf8] sm:$0xff] }
  0x82   : > { %v764_v2 = vsel %vm700_vm15, 1, %v3143_v32  ;;  %vm681_vm0 = vcmp.ne.f32.partialorder %v649_v3, 0.0  ;;  %v1021_v6 = vld [vmem:[%s3469_s5 + $0xf0] sm:$0xff]  ;;  %v666_v7 = vld [vmem:[%s3432_s22 + $0xd8] sm:$0xff]  ;;  %v1019_v13 = vld [vmem:[%s3469_s5 + $0xe0] sm:$0xff]  ;;  %s3607_s20 = scalar_lea.vmem [#allocation8], %s3406_s26 }
  0x83   : > { %v745_v4 = vsel %vm681_vm0, 1, %v3143_v32  ;;  %v665_v8 = vld [vmem:[%s3432_s22 + $0xd0] sm:$0xff]  ;;  %v650_v9 = vld [vmem:[%s3432_s22 + $0x58] sm:$0xff]  ;;  %vm698_vm1 = vcmp.ne.f32.partialorder %v666_v7, 0.0  ;;  %v1004_v14 = vld [vmem:[%s3469_s5 + $0x68] sm:$0xff]  ;;  %s3904_s26 = scalar_lea.vmem [#allocation7], %s3478_s24 }
  0x84   : > { %783 = vperm.xlu2 %2928, %v740_v42   ;;  %777 = vperm.xlu1 %2927, %v738_v43   ;;  %vm697_vm2 = vcmp.ne.f32.partialorder %v665_v8, 0.0  ;;  %vm682_vm3 = vcmp.ne.f32.partialorder %v650_v9, 0.0  ;;  %v762_v10 = vsel %vm698_vm1, 1, %v3143_v32  ;;  %v1003_v15 = vld [vmem:[%s3469_s5 + $0x60] sm:$0xff]  ;;  %v648_v16 = vld [vmem:[%s3432_s22 + $0x48] sm:$0xff]  ;;  %v1001_v23 = vld [vmem:[%s3469_s5 + $0x50] sm:$0xff] }
  0x85   : > { %771 = vperm.xlu0 %2926, %v736_v44   ;;  %v761_v11 = vsel %vm697_vm2, 1, %v3143_v32  ;;  %v746_v12 = vsel %vm682_vm3, 1, %v3143_v32  ;;  %v647_v17 = vld [vmem:[%s3432_s22 + $0x40] sm:$0xff]  ;;  %vm680_vm4 = vcmp.ne.f32.partialorder %v648_v16, 0.0  ;;  %v1020_v20 = vld [vmem:[%s3469_s5 + $0xe8] sm:$0xff]  ;;  %v1018_v26 = vld [vmem:[%s3469_s5 + $0xd8] sm:$0xff] }
  0x86   : > { %vm679_vm5 = vcmp.ne.f32.partialorder %v647_v17, 0.0  ;;  %v744_v18 = vsel %vm680_vm4, 1, %v3143_v32  ;;  %v664_v21 = vld [vmem:[%s3432_s22 + $0xc8] sm:$0xff]  ;;  %v663_v22 = vld [vmem:[%s3432_s22 + $0xc0] sm:$0xff]  ;;  %v1017_v27 = vld [vmem:[%s3469_s5 + $0xd0] sm:$0xff] }
  0x87   : > { %v743_v19 = vsel %vm679_vm5, 1, %v3143_v32  ;;  %vm696_vm6 = vcmp.ne.f32.partialorder %v664_v21, 0.0  ;;  %vm695_vm7 = vcmp.ne.f32.partialorder %v663_v22, 0.0  ;;  %v1002_v28 = vld [vmem:[%s3469_s5 + $0x58] sm:$0xff]  ;;  %v661_v30 = vld [vmem:[%s3432_s22 + $0xb0] sm:$0xff]  ;;  %v999_v33 = vld [vmem:[%s3469_s5 + $0x40] sm:$0xff] }
  0x88   : > { %v760_v24 = vsel %vm696_vm6, 1, %v3143_v32  ;;  %v759_v25 = vsel %vm695_vm7, 1, %v3143_v32  ;;  %v662_v29 = vld [vmem:[%s3432_s22 + $0xb8] sm:$0xff]  ;;  %vm693_vm9 = vcmp.ne.f32.partialorder %v661_v30, 0.0  ;;  %v707_v36 = vld [vmem:[%s3409_s17 + $0x20] sm:$0xff]  ;;  %v708_v37 = vld [vmem:[%s3409_s17 + $0x28] sm:$0xff] }
  0x89   : > { %vm694_vm8 = vcmp.ne.f32.partialorder %v662_v29, 0.0  ;;  %v757_v35 = vsel %vm693_vm9, 1, %v3143_v32  ;;  %v1016_v42 = vld [vmem:[%s3469_s5 + $0xc8] sm:$0xff]  ;;  %v1015_v43 = vld [vmem:[%s3469_s5 + $0xc0] sm:$0xff]  ;;  %v705_v57 = vld [vmem:[%s3409_s17 + $0x10] sm:$0xff] }
  0x8a   : > { %v758_v34 = vsel %vm694_vm8, 1, %v3143_v32  ;;  %v1000_v44 = vld [vmem:[%s3469_s5 + $0x48] sm:$0xff]  ;;  %v659_v46 = vld [vmem:[%s3432_s22 + $0xa0] sm:$0xff]  ;;  %v658_v58 = vld [vmem:[%s3432_s22 + $0x98] sm:$0xff] }
  0x8b   : > { %v660_v45 = vld [vmem:[%s3432_s22 + $0xa8] sm:$0xff]  ;;  %vm691_vm13 = vcmp.ne.f32.partialorder %v659_v46, 0.0  ;;  %v657_v59 = vld [vmem:[%s3432_s22 + $0x90] sm:$0xff]  ;;  %vm690_vm0 = vcmp.ne.f32.partialorder %v658_v58, 0.0  ;;  %v995_v7 = vld [vmem:[%s3469_s5 + $0x20] sm:$0xff] }
  0x8c   : > { %810 = vperm.xlu2 %2928, %v749_v48   ;;  %789 = vperm.xlu1 %2927, %v742_v49   ;;  %vm692_vm12 = vcmp.ne.f32.partialorder %v660_v45, 0.0  ;;  %v997_v48 = vld [vmem:[%s3469_s5 + $0x30] sm:$0xff]  ;;  %vm689_vm2 = vcmp.ne.f32.partialorder %v657_v59, 0.0  ;;  %v754_v8 = vsel %vm690_vm0, 1, %v3143_v32  ;;  %v996_v21 = vld [vmem:[%s3469_s5 + $0x28] sm:$0xff]  ;;  %v718_v29 = vld [vmem:[%s3409_s17 + $0x78] sm:$0xff] }
  0x8d   : > { %786 = vperm.xlu0 %2926, %v741_v50   ;;  %v756_v49 = vsel %vm692_vm12, 1, %v3143_v32  ;;  %v755_v50 = vsel %vm691_vm13, 1, %v3143_v32  ;;  %v656_v22 = vld [vmem:[%s3432_s22 + $0x88] sm:$0xff]  ;;  %v942_v30 = vld [vmem:[%s3587_s14 + $0x78] sm:$0xff]  ;;  %v955_v58 = vld [vmem:[%s3587_s14 + $0xe0] sm:$0xff] }
  0x8e   : > { %vm688_vm8 = vcmp.ne.f32.partialorder %v656_v22, 0.0  ;;  %v716_v46 = vld [vmem:[%s3409_s17 + $0x68] sm:$0xff]  ;;  %v941_v59 = vld [vmem:[%s3587_s14 + $0x70] sm:$0xff] }
  0x8f   : > { %v713_v22 = vld [vmem:[%s3409_s17 + $0x50] sm:$0xff] }
  0x94   : > { %861 = vperm.xlu2 %2928, %v766_v54   ;;  %858 = vperm.xlu1 %2927, %v765_v55   ;;  %v1014_v54 = vld [vmem:[%s3469_s5 + $0xb8] sm:$0xff]  ;;  %v1013_v55 = vld [vmem:[%s3469_s5 + $0xb0] sm:$0xff] }
  0x95   : > { %813 = vperm.xlu0 %2926, %v750_v56   ;;  %v998_v56 = vld [vmem:[%s3469_s5 + $0x38] sm:$0xff] }
  0x9c   : > { %852 = vperm.xlu2 %2928, %v763_v60   ;;  %807 = vperm.xlu1 %2927, %v748_v61   ;;  %v706_v60 = vld [vmem:[%s3409_s17 + $0x18] sm:$0xff] }
  0x9d   : > { %804 = vperm.xlu0 %2926, %v747_v62   ;;  %v703_v62 = vld [vmem:[%s3409_s17] sm:$0xff] }
  0xa4   : > { %1100 = vperm.xlu2 %2928, %v1006_v0   ;;  %1095 = vperm.xlu1 %2927, %v1005_v1   ;;  %v704_v1 = vld [vmem:[%s3409_s17 + $0x8] sm:$0xff] }
  0xa5   : > { %855 = vperm.xlu0 %2926, %v764_v2  }
  0xac   : > { %798 = vperm.xlu2 %2928, %v745_v4   ;;  %1180 = vperm.xlu1 %2927, %v1022_v5  }
  0xad   : > { %1175 = vperm.xlu0 %2926, %v1021_v6  }
  0xb4   : > { %849 = vperm.xlu2 %2928, %v762_v10   ;;  %846 = vperm.xlu1 %2927, %v761_v11   ;;  %v753_v10 = vsel %vm689_vm2, 1, %v3143_v32  ;;  %v710_v11 = vld [vmem:[%s3409_s17 + $0x38] sm:$0xff] }
  0xb5   : > { %801 = vperm.xlu0 %2926, %v746_v12  }
  0xbc   : > { %1165 = vperm.xlu2 %2928, %v1019_v13   ;;  %1090 = vperm.xlu1 %2927, %v1004_v14   ;;  %v709_v14 = vld [vmem:[%s3409_s17 + $0x30] sm:$0xff] }
  0xbd   : > { %1085 = vperm.xlu0 %2926, %v1003_v15  }
  0xc4   : > { %795 = vperm.xlu2 %2928, %v744_v18   ;;  %792 = vperm.xlu1 %2927, %v743_v19   ;;  %v1012_v18 = vld [vmem:[%s3469_s5 + $0xa8] sm:$0xff]  ;;  %v1011_v19 = vld [vmem:[%s3469_s5 + $0xa0] sm:$0xff] }
  0xc5   : > { %1170 = vperm.xlu0 %2926, %v1020_v20  }
  0xcc   : > { %1075 = vperm.xlu2 %2928, %v1001_v23   ;;  %843 = vperm.xlu1 %2927, %v760_v24   ;;  %v655_v23 = vld [vmem:[%s3432_s22 + $0x80] sm:$0xff]  ;;  %v734_v24 = vld [vmem:[%s3409_s17 + $0xf8] sm:$0xff] }
  0xcd   : > { %840 = vperm.xlu0 %2926, %v759_v25   ;;  %v733_v25 = vld [vmem:[%s3409_s17 + $0xf0] sm:$0xff] }
  0xd4   : > { %1160 = vperm.xlu2 %2928, %v1018_v26   ;;  %1155 = vperm.xlu1 %2927, %v1017_v27   ;;  %v717_v26 = vld [vmem:[%s3409_s17 + $0x70] sm:$0xff] }
  0xd5   : > { %1080 = vperm.xlu0 %2926, %v1002_v28  }
  0xd6   : > { %v781_v31 = vpop.permute.xlu2 %780 }
  0xd7   : > { %vm867_vm10 = vcmp.eq.s32.totalorder %v781_v31, 1 }
  0xd8   : > { %v3513_v38 = vsel %vm867_vm10, %v707_v36, 0.0  ;;  %vm687_vm10 = vcmp.ne.f32.partialorder %v655_v23, 0.0 }
  0xdc   : > { %1065 = vperm.xlu2 %2928, %v999_v33   ;;  %837 = vperm.xlu1 %2927, %v758_v34  }
  0xdd   : > { %834 = vperm.xlu0 %2926, %v757_v35  }
  0xde   : > { %v784_v39 = vpop.permute.xlu2 %783 }
  0xdf   : > { %vm868_vm11 = vcmp.eq.s32.totalorder %v784_v39, 1  ;;  %v993_v39 = vld [vmem:[%s3469_s5 + $0x10] sm:$0xff] }
  0xe0   : > { %v3515_v40 = vsel %vm868_vm11, %v708_v37, 0.0 }
  0xe1   : > { %v2619_v41 = vpack.c.bf16 %v3515_v40, %v3513_v38 }
  0xe3   : > { %2767 = vst [vmem:[%s3522_s23 + $0x10] sm:$0xff] %v2619_v41   ;;  %v752_v41 = vsel %vm688_vm8, 1, %v3143_v32 }
  0xe4   : > { %1150 = vperm.xlu2 %2928, %v1016_v42   ;;  %1145 = vperm.xlu1 %2927, %v1015_v43  }
  0xe5   : > { %1070 = vperm.xlu0 %2926, %v1000_v44   ;;  %v751_v44 = vsel %vm687_vm10, 1, %v3143_v32  ;;  %v731_v32 = vld [vmem:[%s3409_s17 + $0xe0] sm:$0xff] }
  0xe6   : > { %v3527_v47 = vpop.permute.xlu2 %810 }
  0xe7   : > { %vm877_vm7 = vcmp.eq.s32.totalorder %v3527_v47, 1 }
  0xe8   : > { %v909_v35 = vsel %vm877_vm7, %v717_v26, 0.0 }
  0xec   : > { %1055 = vperm.xlu2 %2928, %v997_v48   ;;  %831 = vperm.xlu1 %2927, %v756_v49   ;;  %v715_v49 = vld [vmem:[%s3409_s17 + $0x60] sm:$0xff] }
  0xed   : > { %828 = vperm.xlu0 %2926, %v755_v50  }
  0xee   : > { %v3532_v51 = vpop.permute.xlu2 %861  ;;  %v775_v52 = vpop.permute.xlu1 %774 }
  0xef   : > { %v769_v53 = vpop.permute.xlu0 %768  ;;  %vm865_vm14 = vcmp.eq.s32.totalorder %v775_v52, 1  ;;  %vm894_vm6 = vcmp.eq.s32.totalorder %v3532_v51, 1 }
  0xf0   : > { %v3541_v61 = vsel %vm865_vm14, %v705_v57, 0.0  ;;  %vm863_vm15 = vcmp.eq.s32.totalorder %v769_v53, 1  ;;  %v3591_v33 = vsel %vm894_vm6, %v734_v24, 0.0  ;;  %v1010_v53 = vld [vmem:[%s3469_s5 + $0x98] sm:$0xff] }
  0xf1   : > { %v3549_v4 = vsel %vm863_vm15, %v703_v62, 0.0  ;;  %v994_v57 = vld [vmem:[%s3469_s5 + $0x18] sm:$0xff]  ;;  %v973_v62 = vadd.f32 %v941_v59, %v909_v35 }
  0xf4   : > { %1140 = vperm.xlu2 %2928, %v1014_v54   ;;  %1135 = vperm.xlu1 %2927, %v1013_v55   ;;  %v1009_v54 = vld [vmem:[%s3469_s5 + $0x90] sm:$0xff] }
  0xf5   : > { %1060 = vperm.xlu0 %2926, %v998_v56  }
  0xf6   : > { %v3544_v63 = vpop.permute.xlu2 %852  ;;  %v778_v0 = vpop.permute.xlu1 %777 }
  0xf7   : > { %vm866_vm1 = vcmp.eq.s32.totalorder %v778_v0, 1  ;;  %v772_v2 = vpop.permute.xlu0 %771  ;;  %vm891_vm12 = vcmp.eq.s32.totalorder %v3544_v63, 1 }
  0xf8   : > { %v3547_v3 = vsel %vm866_vm1, %v706_v60, 0.0  ;;  %vm864_vm3 = vcmp.eq.s32.totalorder %v772_v2, 1  ;;  %v923_v55 = vsel %vm891_vm12, %v731_v32, 0.0  ;;  %v939_v32 = vld [vmem:[%s3587_s14 + $0x60] sm:$0xff] }
  0xf9   : > { %v2614_v5 = vpack.c.bf16 %v3547_v3, %v3541_v61  ;;  %v3553_v6 = vsel %vm864_vm3, %v704_v1, 0.0  ;;  %v987_v60 = vadd.f32 %v955_v58, %v923_v55  ;;  %v732_v1 = vld [vmem:[%s3409_s17 + $0xe8] sm:$0xff] }
  0xfa   : > { %v2609_v9 = vpack.c.bf16 %v3553_v6, %v3549_v4 }
  0xfb   : > { %2766 = vst [vmem:[%s3522_s23 + $0x8] sm:$0xff] %v2614_v5  }
  0xfc   : > { %2610 = vst [vmem:[%s3522_s23] sm:$0xff] %v2609_v9   ;;  %1045 = vperm.xlu2 %2928, %v995_v7   ;;  %825 = vperm.xlu1 %2927, %v754_v8  }
  0xfd   : > { %822 = vperm.xlu0 %2926, %v753_v10   ;;  %v1007_v10 = vld [vmem:[%s3469_s5 + $0x80] sm:$0xff] }
  0xfe   : > { %v1101_v12 = vpop.permute.xlu2 %1100  ;;  %v790_v13 = vpop.permute.xlu1 %789 }
  0xff   : > { %vm870_vm4 = vcmp.eq.s32.totalorder %v790_v13, 1  ;;  %v787_v15 = vpop.permute.xlu0 %786  ;;  %v991_v13 = vld [vmem:[%s3469_s5] sm:$0xff] }
 0x100   : > { %v3564_v16 = vsel %vm870_vm4, %v710_v11, 0.0  ;;  %vm869_vm5 = vcmp.eq.s32.totalorder %v787_v15, 1  ;;  %v992_v11 = vld [vmem:[%s3469_s5 + $0x8] sm:$0xff]  ;;  %v957_v15 = vld [vmem:[%s3587_s14 + $0xf0] sm:$0xff] }
 0x101   : > { %v3566_v17 = vsel %vm869_vm5, %v709_v14, 0.0  ;;  %v958_v14 = vld [vmem:[%s3587_s14 + $0xf8] sm:$0xff] }
 0x102   : > { %v2624_v20 = vpack.c.bf16 %v3564_v16, %v3566_v17 }
 0x104   : > { %2768 = vst [vmem:[%s3522_s23 + $0x18] sm:$0xff] %v2624_v20   ;;  %1130 = vperm.xlu2 %2928, %v1012_v18   ;;  %1125 = vperm.xlu1 %2927, %v1011_v19   ;;  %v990_v18 = vadd.f32 %v958_v14, %v3591_v33 }
 0x105   : > { %1050 = vperm.xlu0 %2926, %v996_v21  }
 0x106   : > { %v3581_v27 = vpop.permute.xlu2 %798  ;;  %v859_v28 = vpop.permute.xlu1 %858 }
 0x107   : > { %vm893_vm9 = vcmp.eq.s32.totalorder %v859_v28, 1  ;;  %v814_v31 = vpop.permute.xlu0 %813  ;;  %vm873_vm0 = vcmp.eq.s32.totalorder %v3581_v27, 1 }
 0x108   : > { %v3593_v34 = vsel %vm893_vm9, %v733_v25, 0.0  ;;  %vm878_vm11 = vcmp.eq.s32.totalorder %v814_v31, 1  ;;  %v905_v26 = vsel %vm873_vm0, %v713_v22, 0.0  ;;  %v937_v31 = vld [vmem:[%s3587_s14 + $0x50] sm:$0xff] }
 0x109   : > { %v2684_v36 = vpack.c.bf16 %v3591_v33, %v3593_v34  ;;  %v910_v37 = vsel %vm878_vm11, %v718_v29, 0.0  ;;  %v989_v21 = vadd.f32 %v957_v15, %v3593_v34  ;;  %v1008_v29 = vld [vmem:[%s3469_s5 + $0x88] sm:$0xff]  ;;  %v730_v33 = vld [vmem:[%s3409_s17 + $0xd8] sm:$0xff]  ;;  %v969_v27 = vadd.f32 %v937_v31, %v905_v26  ;;  %v729_v34 = vld [vmem:[%s3409_s17 + $0xd0] sm:$0xff] }
 0x10a   : > { %v974_v42 = vadd.f32 %v942_v30, %v910_v37  ;;  %v2644_v43 = vpack.c.bf16 %v910_v37, %v909_v35  ;;  %v714_v37 = vld [vmem:[%s3409_s17 + $0x58] sm:$0xff] }
 0x10b   : > { %2780 = vst [vmem:[%s3522_s23 + $0x78] sm:$0xff] %v2684_v36  }
 0x10c   : > { %2772 = vst [vmem:[%s3522_s23 + $0x38] sm:$0xff] %v2644_v43   ;;  %1035 = vperm.xlu2 %2928, %v993_v39   ;;  %819 = vperm.xlu1 %2927, %v752_v41   ;;  %v1198_v45 = vmul.f32 %v1101_v12, %v974_v42 }
 0x10d   : > { %816 = vperm.xlu0 %2926, %v751_v44  }
 0x10e   : > { %v3603_v47 = vpop.permute.xlu2 %849  ;;  %v808_v48 = vpop.permute.xlu1 %807  ;;  %1294 = vst [vmem:[%s3607_s20 + $0x78] sm:$0xff] %v1198_v45 }
 0x10f   : > { %vm876_vm13 = vcmp.eq.s32.totalorder %v808_v48, 1  ;;  %v805_v50 = vpop.permute.xlu0 %804  ;;  %vm890_vm1 = vcmp.eq.s32.totalorder %v3603_v47, 1  ;;  %v954_v47 = vld [vmem:[%s3587_s14 + $0xd8] sm:$0xff]  ;;  %v940_v48 = vld [vmem:[%s3587_s14 + $0x68] sm:$0xff] }
 0x110   : > { %v3612_v51 = vsel %vm876_vm13, %v716_v46, 0.0  ;;  %vm875_vm14 = vcmp.eq.s32.totalorder %v805_v50, 1  ;;  %v922_v42 = vsel %vm890_vm1, %v730_v33, 0.0  ;;  %v938_v33 = vld [vmem:[%s3587_s14 + $0x58] sm:$0xff] }
 0x111   : > { %v3614_v52 = vsel %vm875_vm14, %v715_v49, 0.0  ;;  %v986_v50 = vadd.f32 %v954_v47, %v922_v42 }
 0x112   : > { %v2639_v56 = vpack.c.bf16 %v3612_v51, %v3614_v52 }
 0x114   : > { %2771 = vst [vmem:[%s3522_s23 + $0x30] sm:$0xff] %v2639_v56   ;;  %1120 = vperm.xlu2 %2928, %v1010_v53   ;;  %1115 = vperm.xlu1 %2927, %v1009_v54   ;;  %v972_v53 = vadd.f32 %v940_v48, %v3612_v51  ;;  %v971_v56 = vadd.f32 %v939_v32, %v3614_v52  ;;  %v712_v51 = vld [vmem:[%s3409_s17 + $0x48] sm:$0xff]  ;;  %v935_v52 = vld [vmem:[%s3587_s14 + $0x40] sm:$0xff] }
 0x115   : > { %1040 = vperm.xlu0 %2926, %v994_v57  }
 0x116   : > { %v1166_v63 = vpop.permute.xlu2 %1165  ;;  %v1096_v0 = vpop.permute.xlu1 %1095 }
 0x117   : > { %v3625_v2 = vmul.f32 %v1166_v63, %v987_v60  ;;  %v1197_v5 = vmul.f32 %v1096_v0, %v973_v62  ;;  %v856_v7 = vpop.permute.xlu0 %855  ;;  %v956_v63 = vld [vmem:[%s3587_s14 + $0xe8] sm:$0xff]  ;;  %v711_v0 = vld [vmem:[%s3409_s17 + $0x40] sm:$0xff] }
 0x118   : > { %vm892_vm15 = vcmp.eq.s32.totalorder %v856_v7, 1 }
 0x119   : > { %1307 = vst [vmem:[%s3607_s20 + $0xe0] sm:$0xff] %v3625_v2  ;;  %v2724_v8 = vpack.c.bf16 %v1198_v45, %v1197_v5  ;;  %v3629_v9 = vsel %vm892_vm15, %v732_v1, 0.0 }
 0x11a   : > { %1293 = vst [vmem:[%s3607_s20 + $0x70] sm:$0xff] %v1197_v5  ;;  %v2679_v12 = vpack.c.bf16 %v3629_v9, %v923_v55  ;;  %v988_v7 = vadd.f32 %v956_v63, %v3629_v9  ;;  %v728_v9 = vld [vmem:[%s3409_s17 + $0xc8] sm:$0xff] }
 0x11b   : > { %2787 = vst [vmem:[#allocation2 + $0x48] sm:$0xff] %v2724_v8  }
 0x11c   : > { %2779 = vst [vmem:[%s3522_s23 + $0x70] sm:$0xff] %v2679_v12   ;;  %1105 = vperm.xlu2 %2928, %v1007_v10   ;;  %1030 = vperm.xlu1 %2927, %v992_v11  }
 0x11d   : > { %1025 = vperm.xlu0 %2926, %v991_v13  }
 0x11e   : > { %v3640_v19 = vpop.permute.xlu2 %795  ;;  %v1181_v20 = vpop.permute.xlu1 %1180 }
 0x11f   : > { %v1214_v23 = vmul.f32 %v1181_v20, %v990_v18  ;;  %v1176_v24 = vpop.permute.xlu0 %1175  ;;  %vm872_vm4 = vcmp.eq.s32.totalorder %v3640_v19, 1 }
 0x120   : > { %v1213_v25 = vmul.f32 %v1176_v24, %v989_v21  ;;  %v3682_v10 = vsel %vm872_vm4, %v712_v51, 0.0  ;;  %v952_v21 = vld [vmem:[%s3587_s14 + $0xc8] sm:$0xff] }
 0x121   : > { %1310 = vst [vmem:[%s3607_s20 + $0xf8] sm:$0xff] %v1214_v23 }
 0x122   : > { %1309 = vst [vmem:[%s3607_s20 + $0xf0] sm:$0xff] %v1213_v25  ;;  %v2764_v28 = vpack.c.bf16 %v1214_v23, %v1213_v25  ;;  %v2596_v30 = vld [vmem:[#allocation2 + $0x48] sm:$0xff]  ;;  %v727_v23 = vld [vmem:[%s3409_s17 + $0xc0] sm:$0xff] }
 0x123   : > { %1695 = vmatpush.bf16.msra.mxu0 %v2596_v30  ;;  %2796 = vmatpush.bf16.msra.mxu2 %v2596_v30  ;;  %v953_v30 = vld [vmem:[%s3587_s14 + $0xd0] sm:$0xff] }
 0x124   : > { %2795 = vst [vmem:[#allocation2 + $0x28] sm:$0xff] %v2764_v28  }
 0x125   : > { %1110 = vperm.xlu0 %2926, %v1008_v29   ;;  %v933_v29 = vld [vmem:[%s3587_s14 + $0x30] sm:$0xff] }
 0x126   : > { %v1076_v35 = vpop.permute.xlu2 %1075  ;;  %v847_v36 = vpop.permute.xlu1 %846 }
 0x127   : > { %v3653_v39 = vmul.f32 %v1076_v35, %v969_v27  ;;  %vm889_vm2 = vcmp.eq.s32.totalorder %v847_v36, 1  ;;  %v802_v41 = vpop.permute.xlu0 %801 }
 0x128   : > { %v3655_v43 = vsel %vm889_vm2, %v729_v34, 0.0  ;;  %vm874_vm3 = vcmp.eq.s32.totalorder %v802_v41, 1  ;;  %v965_v34 = vadd.f32 %v933_v29, %v3566_v17 }
 0x129   : > { %1289 = vst [vmem:[%s3607_s20 + $0x50] sm:$0xff] %v3653_v39  ;;  %v2674_v44 = vpack.c.bf16 %v922_v42, %v3655_v43  ;;  %v3660_v45 = vsel %vm874_vm3, %v714_v37, 0.0  ;;  %v985_v35 = vadd.f32 %v953_v30, %v3655_v43  ;;  %v726_v43 = vld [vmem:[%s3409_s17 + $0xb8] sm:$0xff] }
 0x12a   : > { %v2634_v46 = vpack.c.bf16 %v3660_v45, %v905_v26  ;;  %v970_v41 = vadd.f32 %v938_v33, %v3660_v45 }
 0x12b   : > { %2778 = vst [vmem:[%s3522_s23 + $0x68] sm:$0xff] %v2674_v44   ;;  %v2604_v49 = vld [vmem:[#allocation2 + $0x28] sm:$0xff] }
 0x12c   : > { %2770 = vst [vmem:[%s3522_s23 + $0x28] sm:$0xff] %v2634_v46   ;;  %1784 = vmatpush.bf16.msra.mxu1 %v2604_v49  ;;  %2804 = vmatpush.bf16.msra.mxu3 %v2604_v49  ;;  %v950_v49 = vld [vmem:[%s3587_s14 + $0xb8] sm:$0xff] }
 0x12e   : > { %v1161_v54 = vpop.permute.xlu2 %1160  ;;  %v1091_v55 = vpop.permute.xlu1 %1090 }
 0x12f   : > { %v3670_v57 = vmul.f32 %v1161_v54, %v986_v50  ;;  %v1196_v58 = vmul.f32 %v1091_v55, %v972_v53  ;;  %v1086_v59 = vpop.permute.xlu0 %1085  ;;  %v725_v50 = vld [vmem:[%s3409_s17 + $0xb0] sm:$0xff] }
 0x130   : > { %v1195_v60 = vmul.f32 %v1086_v59, %v971_v56  ;;  %v951_v59 = vld [vmem:[%s3587_s14 + $0xc0] sm:$0xff] }
 0x131   : > { %1306 = vst [vmem:[%s3607_s20 + $0xd8] sm:$0xff] %v3670_v57 }
 0x132   : > { %1292 = vst [vmem:[%s3607_s20 + $0x68] sm:$0xff] %v1196_v58  ;;  %v2719_v62 = vpack.c.bf16 %v1196_v58, %v1195_v60  ;;  %v931_v58 = vld [vmem:[%s3587_s14 + $0x20] sm:$0xff] }
 0x133   : > { %1291 = vst [vmem:[%s3607_s20 + $0x60] sm:$0xff] %v1195_v60  ;;  %v936_v60 = vld [vmem:[%s3587_s14 + $0x48] sm:$0xff]  ;;  %v963_v51 = vadd.f32 %v931_v58, %v3513_v38 }
 0x134   : > { %2786 = vst [vmem:[#allocation2 + $0x8] sm:$0xff] %v2719_v62  }
 0x136   : > { %v1066_v1 = vpop.permute.xlu2 %1065  ;;  %v793_v5 = vpop.permute.xlu1 %792 }
 0x137   : > { %vm871_vm5 = vcmp.eq.s32.totalorder %v793_v5, 1  ;;  %v1171_v8 = vpop.permute.xlu0 %1170  ;;  %v968_v5 = vadd.f32 %v936_v60, %v3682_v10 }
 0x138   : > { %v903_v11 = vsel %vm871_vm5, %v711_v0, 0.0  ;;  %v1212_v12 = vmul.f32 %v1171_v8, %v988_v7 }
 0x139   : > { %v967_v13 = vadd.f32 %v935_v52, %v903_v11  ;;  %v2629_v14 = vpack.c.bf16 %v3682_v10, %v903_v11 }
 0x13a   : > { %1308 = vst [vmem:[%s3607_s20 + $0xe8] sm:$0xff] %v1212_v12  ;;  %v2759_v15 = vpack.c.bf16 %v1212_v12, %v3625_v2 }
 0x13b   : > { %2769 = vst [vmem:[%s3522_s23 + $0x20] sm:$0xff] %v2629_v14   ;;  %v2595_v18 = vld [vmem:[#allocation2 + $0x8] sm:$0xff]  ;;  %v3688_v19 = vmul.f32 %v1066_v1, %v967_v13 }
 0x13c   : > { %2794 = vst [vmem:[#allocation2 + $0x78] sm:$0xff] %v2759_v15   ;;  %1696 = vmatpush.bf16.msra.mxu0 %v2595_v18  ;;  %2797 = vmatpush.bf16.msra.mxu2 %v2595_v18  ;;  %v724_v14 = vld [vmem:[%s3409_s17 + $0xa8] sm:$0xff] }
 0x13d   : > { %1287 = vst [vmem:[%s3607_s20 + $0x40] sm:$0xff] %v3688_v19  ;;  %v948_v15 = vld [vmem:[%s3587_s14 + $0xa8] sm:$0xff] }
 0x13e   : > { %v1151_v20 = vpop.permute.xlu2 %1150  ;;  %v844_v22 = vpop.permute.xlu1 %843 }
 0x13f   : > { %vm888_vm6 = vcmp.eq.s32.totalorder %v844_v22, 1  ;;  %v841_v2 = vpop.permute.xlu0 %840 }
 0x140   : > { %v920_v24 = vsel %vm888_vm6, %v728_v9, 0.0  ;;  %vm887_vm7 = vcmp.eq.s32.totalorder %v841_v2, 1  ;;  %v723_v9 = vld [vmem:[%s3409_s17 + $0xa0] sm:$0xff] }
 0x141   : > { %v984_v25 = vadd.f32 %v952_v21, %v920_v24  ;;  %v919_v26 = vsel %vm887_vm7, %v727_v23, 0.0 }
 0x142   : > { %v2669_v28 = vpack.c.bf16 %v920_v24, %v919_v26  ;;  %v983_v0 = vadd.f32 %v951_v59, %v919_v26  ;;  %v929_v24 = vld [vmem:[%s3587_s14 + $0x10] sm:$0xff]  ;;  %v934_v26 = vld [vmem:[%s3587_s14 + $0x38] sm:$0xff] }
 0x143   : > { %v2603_v31 = vld [vmem:[#allocation2 + $0x78] sm:$0xff]  ;;  %v1208_v27 = vmul.f32 %v1151_v20, %v984_v25  ;;  %v949_v25 = vld [vmem:[%s3587_s14 + $0xb0] sm:$0xff]  ;;  %v961_v30 = vadd.f32 %v929_v24, %v3541_v61 }
 0x144   : > { %2777 = vst [vmem:[%s3522_s23 + $0x60] sm:$0xff] %v2669_v28   ;;  %1785 = vmatpush.bf16.msra.mxu1 %v2603_v31  ;;  %2805 = vmatpush.bf16.msra.mxu3 %v2603_v31 }
 0x145   : > { %1304 = vst [vmem:[%s3607_s20 + $0xc8] sm:$0xff] %v1208_v27 }
 0x146   : > { %v1056_v36 = vpop.permute.xlu2 %1055  ;;  %v1156_v37 = vpop.permute.xlu1 %1155 }
 0x147   : > { %v3703_v42 = vmul.f32 %v1056_v36, %v965_v34  ;;  %v1209_v44 = vmul.f32 %v1156_v37, %v985_v35  ;;  %v1081_v46 = vpop.permute.xlu0 %1080  ;;  %v966_v34 = vadd.f32 %v934_v26, %v3564_v16  ;;  %v927_v26 = vld [vmem:[%s3587_s14] sm:$0xff] }
 0x148   : > { %v1194_v47 = vmul.f32 %v1081_v46, %v970_v41  ;;  %v722_v46 = vld [vmem:[%s3409_s17 + $0x98] sm:$0xff] }
 0x149   : > { %1285 = vst [vmem:[%s3607_s20 + $0x30] sm:$0xff] %v3703_v42  ;;  %v2754_v48 = vpack.c.bf16 %v3670_v57, %v1209_v44 }
 0x14a   : > { %1305 = vst [vmem:[%s3607_s20 + $0xd0] sm:$0xff] %v1209_v44  ;;  %v2714_v17 = vpack.c.bf16 %v1194_v47, %v3653_v39 }
 0x14b   : > { %2793 = vst [vmem:[#allocation2 + $0x70] sm:$0xff] %v2754_v48   ;;  %v721_v48 = vld [vmem:[%s3409_s17 + $0x90] sm:$0xff] }
 0x14c   : > { %1290 = vst [vmem:[%s3607_s20 + $0x58] sm:$0xff] %v1194_v47  ;;  %v946_v47 = vld [vmem:[%s3587_s14 + $0x98] sm:$0xff] }
 0x14d   : > { %2785 = vst [vmem:[#allocation2 + $0x68] sm:$0xff] %v2714_v17  }
 0x14e   : > { %v1141_v45 = vpop.permute.xlu2 %1140  ;;  %v838_v32 = vpop.permute.xlu1 %837 }
 0x14f   : > { %vm886_vm8 = vcmp.eq.s32.totalorder %v838_v32, 1  ;;  %v835_v53 = vpop.permute.xlu0 %834 }
 0x150   : > { %v918_v54 = vsel %vm886_vm8, %v726_v43, 0.0  ;;  %vm885_vm9 = vcmp.eq.s32.totalorder %v835_v53, 1  ;;  %v947_v53 = vld [vmem:[%s3587_s14 + $0xa0] sm:$0xff] }
 0x151   : > { %v982_v55 = vadd.f32 %v950_v49, %v918_v54  ;;  %v917_v56 = vsel %vm885_vm9, %v725_v50, 0.0 }
 0x152   : > { %v2664_v39 = vpack.c.bf16 %v918_v54, %v917_v56  ;;  %v2602_v57 = vld [vmem:[#allocation2 + $0x70] sm:$0xff]  ;;  %v981_v31 = vadd.f32 %v949_v25, %v917_v56  ;;  %v932_v54 = vld [vmem:[%s3587_s14 + $0x28] sm:$0xff] }
 0x153   : > { %v1206_v62 = vmul.f32 %v1141_v45, %v982_v55  ;;  %1786 = vmatpush.bf16.msra.mxu1 %v2602_v57  ;;  %2806 = vmatpush.bf16.msra.mxu3 %v2602_v57  ;;  %v964_v58 = vadd.f32 %v932_v54, %v3515_v40  ;;  %v928_v25 = vld [vmem:[%s3587_s14 + $0x8] sm:$0xff]  ;;  %v2424_v54 = vld [vmem:[%s3413_s6 + $0x90] sm:$0xf] }
 0x154   : > { %2776 = vst [vmem:[%s3522_s23 + $0x58] sm:$0xff] %v2664_v39   ;;  %v2594_v63 = vld [vmem:[#allocation2 + $0x68] sm:$0xff] }
 0x155   : > { %1302 = vst [vmem:[%s3607_s20 + $0xb8] sm:$0xff] %v1206_v62  ;;  %1697 = vmatpush.bf16.msra.mxu0 %v2594_v63  ;;  %2798 = vmatpush.bf16.msra.mxu2 %v2594_v63 }
 0x156   : > { %v1046_v1 = vpop.permute.xlu2 %1045  ;;  %v1146_v52 = vpop.permute.xlu1 %1145 }
 0x157   : > { %v3721_v7 = vmul.f32 %v1046_v1, %v963_v51  ;;  %v1207_v8 = vmul.f32 %v1146_v52, %v983_v0  ;;  %v1071_v11 = vpop.permute.xlu0 %1070  ;;  %v720_v0 = vld [vmem:[%s3409_s17 + $0x88] sm:$0xff]  ;;  %v719_v52 = vld [vmem:[%s3409_s17 + $0x80] sm:$0xff] }
 0x158   : > { %v1192_v12 = vmul.f32 %v1071_v11, %v968_v5  ;;  %v943_v5 = vld [vmem:[%s3587_s14 + $0x80] sm:$0xff] }
 0x159   : > { %1283 = vst [vmem:[%s3607_s20 + $0x20] sm:$0xff] %v3721_v7  ;;  %v2749_v38 = vpack.c.bf16 %v1208_v27, %v1207_v8 }
 0x15a   : > { %1303 = vst [vmem:[%s3607_s20 + $0xc0] sm:$0xff] %v1207_v8  ;;  %v2709_v13 = vpack.c.bf16 %v1192_v12, %v3688_v19 }
 0x15b   : > { %2792 = vst [vmem:[#allocation2 + $0x60] sm:$0xff] %v2749_v38  }
 0x15c   : > { %1288 = vst [vmem:[%s3607_s20 + $0x48] sm:$0xff] %v1192_v12 }
 0x15d   : > { %2784 = vst [vmem:[#allocation2 + $0x50] sm:$0xff] %v2709_v13  }
 0x15e   : > { %v1131_v10 = vpop.permute.xlu2 %1130  ;;  %v832_v18 = vpop.permute.xlu1 %831 }
 0x15f   : > { %vm884_vm10 = vcmp.eq.s32.totalorder %v832_v18, 1  ;;  %v829_v20 = vpop.permute.xlu0 %828 }
 0x160   : > { %v916_v21 = vsel %vm884_vm10, %v724_v14, 0.0  ;;  %vm883_vm11 = vcmp.eq.s32.totalorder %v829_v20, 1  ;;  %v945_v14 = vld [vmem:[%s3587_s14 + $0x90] sm:$0xff] }
 0x161   : > { %v980_v22 = vadd.f32 %v948_v15, %v916_v21  ;;  %v915_v23 = vsel %vm883_vm11, %v723_v9, 0.0  ;;  %v930_v15 = vld [vmem:[%s3587_s14 + $0x18] sm:$0xff] }
 0x162   : > { %v2659_v19 = vpack.c.bf16 %v916_v21, %v915_v23  ;;  %v2601_v2 = vld [vmem:[#allocation2 + $0x60] sm:$0xff]  ;;  %v979_v39 = vadd.f32 %v947_v53, %v915_v23  ;;  %v962_v21 = vadd.f32 %v930_v15, %v3547_v3  ;;  %v959_v3 = vadd.f32 %v927_v26, %v3549_v4  ;;  %v2440_v15 = vld [vmem:[%s3413_s6 + $0xb0] sm:$0xf] }
 0x163   : > { %v1204_v28 = vmul.f32 %v1131_v10, %v980_v22  ;;  %1787 = vmatpush.bf16.msra.mxu1 %v2601_v2  ;;  %2807 = vmatpush.bf16.msra.mxu3 %v2601_v2 }
 0x164   : > { %2775 = vst [vmem:[%s3522_s23 + $0x50] sm:$0xff] %v2659_v19   ;;  %v2593_v29 = vld [vmem:[#allocation2 + $0x50] sm:$0xff] }
 0x165   : > { %1300 = vst [vmem:[%s3607_s20 + $0xa8] sm:$0xff] %v1204_v28  ;;  %1698 = vmatpush.bf16.msra.mxu0 %v2593_v29  ;;  %2799 = vmatpush.bf16.msra.mxu2 %v2593_v29 }
 0x166   : > { %v1036_v33 = vpop.permute.xlu2 %1035  ;;  %v1136_v27 = vpop.permute.xlu1 %1135 }
 0x167   : > { %v3738_v35 = vmul.f32 %v1036_v33, %v961_v30  ;;  %v1205_v36 = vmul.f32 %v1136_v27, %v981_v31  ;;  %v1061_v37 = vpop.permute.xlu0 %1060 }
 0x168   : > { %v1190_v41 = vmul.f32 %v1061_v37, %v966_v34 }
 0x169   : > { %1281 = vst [vmem:[%s3607_s20 + $0x10] sm:$0xff] %v3738_v35  ;;  %v2744_v61 = vpack.c.bf16 %v1206_v62, %v1205_v36 }
 0x16a   : > { %1301 = vst [vmem:[%s3607_s20 + $0xb0] sm:$0xff] %v1205_v36  ;;  %v2704_v44 = vpack.c.bf16 %v1190_v41, %v3703_v42  ;;  %v944_v36 = vld [vmem:[%s3587_s14 + $0x88] sm:$0xff] }
 0x16b   : > { %2791 = vst [vmem:[#allocation2 + $0x38] sm:$0xff] %v2744_v61   ;;  %v2574_v61 = vld [vmem:[%s3413_s6 + $0x84] sm:$0xf0] }
 0x16c   : > { %1286 = vst [vmem:[%s3607_s20 + $0x38] sm:$0xff] %v1190_v41  ;;  %v2416_v41 = vld [vmem:[%s3413_s6 + $0x80] sm:$0xf] }
 0x16d   : > { %2783 = vst [vmem:[#allocation2 + $0x18] sm:$0xff] %v2704_v44   ;;  %v2352_v44 = vld [vmem:[%s3413_s6] sm:$0xf] }
 0x16e   : > { %v826_v16 = vpop.permute.xlu1 %825  ;;  %v1121_v32 = vpop.permute.xlu2 %1120 }
 0x16f   : > { %vm882_vm12 = vcmp.eq.s32.totalorder %v826_v16, 1  ;;  %v823_v17 = vpop.permute.xlu0 %822 }
 0x170   : > { %v914_v43 = vsel %vm882_vm12, %v722_v46, 0.0  ;;  %vm881_vm13 = vcmp.eq.s32.totalorder %v823_v17, 1  ;;  %v2558_v46 = vld [vmem:[%s3413_s6 + $0x4] sm:$0xf0] }
 0x171   : > { %v978_v45 = vadd.f32 %v946_v47, %v914_v43  ;;  %v913_v49 = vsel %vm881_vm13, %v721_v48, 0.0  ;;  %v2417_v48 = vor.u32 %v2574_v61, %v2416_v41  ;;  %v2353_v17 = vor.u32 %v2558_v46, %v2352_v44  ;;  %v2584_v41 = vld [vmem:[%s3413_s6 + $0xd4] sm:$0xf0]  ;;  %v2392_v61 = vld [vmem:[%s3413_s6 + $0x50] sm:$0xf] }
 0x172   : > { %v2654_v50 = vpack.c.bf16 %v914_v43, %v913_v49  ;;  %v2600_v42 = vld [vmem:[#allocation2 + $0x38] sm:$0xff]  ;;  %v977_v9 = vadd.f32 %v945_v14, %v913_v49  ;;  %v2557_v43 = vld [vmem:[%s3413_s6 + $0x4] sm:$0xf]  ;;  %v2434_v14 = vld [vmem:[%s3413_s6 + $0xa8] sm:$0xf0] }
 0x173   : > { %v1202_v55 = vmul.f32 %v1121_v32, %v978_v45  ;;  %1788 = vmatpush.bf16.msra.mxu1 %v2600_v42  ;;  %2808 = vmatpush.bf16.msra.mxu3 %v2600_v42  ;;  %v2354_v45 = vld [vmem:[%s3413_s6 + $0x8] sm:$0xf0]  ;;  %v2573_v49 = vld [vmem:[%s3413_s6 + $0x84] sm:$0xf]  ;;  %v2568_v44 = vld [vmem:[%s3413_s6 + $0x54] sm:$0xf0] }
 0x174   : > { %2774 = vst [vmem:[%s3522_s23 + $0x48] sm:$0xff] %v2654_v50   ;;  %v2592_v56 = vld [vmem:[#allocation2 + $0x18] sm:$0xff]  ;;  %v2418_v32 = vld [vmem:[%s3413_s6 + $0x88] sm:$0xf0]  ;;  %v2357_v42 = vor.u32 %v2557_v43, %v2354_v45 }
 0x175   : > { %1298 = vst [vmem:[%s3607_s20 + $0x98] sm:$0xff] %v1202_v55  ;;  %1699 = vmatpush.bf16.msra.mxu0 %v2592_v56  ;;  %2800 = vmatpush.bf16.msra.mxu2 %v2592_v56  ;;  %v2421_v53 = vor.u32 %v2573_v49, %v2418_v32  ;;  %v2360_v56 = vld [vmem:[%s3413_s6 + $0x10] sm:$0xf]  ;;  %v2458_v43 = vld [vmem:[%s3413_s6 + $0xd8] sm:$0xf0] }
 0x176   : > { %v1126_v57 = vpop.permute.xlu1 %1125  ;;  %v1106_v10 = vpop.permute.xlu2 %1105  ;;  %v2464_v32 = vld [vmem:[%s3413_s6 + $0xe0] sm:$0xf] }
 0x177   : > { %v1203_v59 = vmul.f32 %v1126_v57, %v979_v39  ;;  %v1051_v60 = vpop.permute.xlu0 %1050  ;;  %v2560_v39 = vld [vmem:[%s3413_s6 + $0x14] sm:$0xf0] }
 0x178   : > { %v1188_v62 = vmul.f32 %v1051_v60, %v964_v58  ;;  %v2361_v58 = vor.u32 %v2560_v39, %v2360_v56  ;;  %v2362_v60 = vld [vmem:[%s3413_s6 + $0x18] sm:$0xf0]  ;;  %v2569_v56 = vld [vmem:[%s3413_s6 + $0x64] sm:$0xf]  ;;  %v2402_v39 = vld [vmem:[%s3413_s6 + $0x68] sm:$0xf0] }
 0x179   : > { %1299 = vst [vmem:[%s3607_s20 + $0xa0] sm:$0xff] %v1203_v59  ;;  %v2739_v63 = vpack.c.bf16 %v1204_v28, %v1203_v59  ;;  %v960_v28 = vadd.f32 %v928_v25, %v3553_v6  ;;  %v2559_v59 = vld [vmem:[%s3413_s6 + $0x14] sm:$0xf] }
 0x17a   : > { %1284 = vst [vmem:[%s3607_s20 + $0x28] sm:$0xff] %v1188_v62  ;;  %v2699_v51 = vpack.c.bf16 %v1188_v62, %v3721_v7  ;;  %v2575_v62 = vld [vmem:[%s3413_s6 + $0x94] sm:$0xf] }
 0x17b   : > { %2790 = vst [vmem:[#allocation2 + $0x10] sm:$0xff] %v2739_v63   ;;  %v2426_v63 = vld [vmem:[%s3413_s6 + $0x98] sm:$0xf0] }
 0x17c   : > { %2782 = vst [vmem:[#allocation2 + $0x58] sm:$0xff] %v2699_v51   ;;  %v2365_v51 = vor.u32 %v2559_v59, %v2362_v60  ;;  %v2405_v59 = vor.u32 %v2569_v56, %v2402_v39 }
 0x17e   : > { %v820_v1 = vpop.permute.xlu1 %819 }
 0x17f   : > { %vm880_vm14 = vcmp.eq.s32.totalorder %v820_v1, 1  ;;  %v817_v8 = vpop.permute.xlu0 %816  ;;  %v2432_v1 = vld [vmem:[%s3413_s6 + $0xa0] sm:$0xf] }
 0x180   : > { %v912_v40 = vsel %vm880_vm14, %v720_v0, 0.0  ;;  %vm879_vm15 = vcmp.eq.s32.totalorder %v817_v8, 1  ;;  %v2429_v0 = vor.u32 %v2575_v62, %v2426_v63  ;;  %v2562_v8 = vld [vmem:[%s3413_s6 + $0x24] sm:$0xf0]  ;;  %v2472_v62 = vld [vmem:[%s3413_s6 + $0xf0] sm:$0xf] }
 0x181   : > { %v911_v11 = vsel %vm879_vm15, %v719_v52, 0.0  ;;  %v976_v4 = vadd.f32 %v944_v36, %v912_v40  ;;  %v2578_v52 = vld [vmem:[%s3413_s6 + $0xa4] sm:$0xf0]  ;;  %v2450_v36 = vld [vmem:[%s3413_s6 + $0xc8] sm:$0xf0] }
 0x182   : > { %v975_v12 = vadd.f32 %v943_v5, %v911_v11  ;;  %v2649_v38 = vpack.c.bf16 %v912_v40, %v911_v11  ;;  %v2599_v13 = vld [vmem:[#allocation2 + $0x10] sm:$0xff]  ;;  %v2368_v5 = vld [vmem:[%s3413_s6 + $0x20] sm:$0xf]  ;;  %v2433_v40 = vor.u32 %v2578_v52, %v2432_v1  ;;  %v2588_v63 = vld [vmem:[%s3413_s6 + $0xf4] sm:$0xf0] }
 0x183   : > { %v2591_v7 = vld [vmem:[#allocation2 + $0x58] sm:$0xff]  ;;  %1789 = vmatpush.bf16.msra.mxu1 %v2599_v13  ;;  %2809 = vmatpush.bf16.msra.mxu3 %v2599_v13  ;;  %v2369_v11 = vor.u32 %v2562_v8, %v2368_v5  ;;  %v2577_v13 = vld [vmem:[%s3413_s6 + $0xa4] sm:$0xf]  ;;  %v2473_v1 = vor.u32 %v2588_v63, %v2472_v62  ;;  %v2571_v5 = vld [vmem:[%s3413_s6 + $0x74] sm:$0xf] }
 0x184   : > { %2773 = vst [vmem:[%s3522_s23 + $0x40] sm:$0xff] %v2649_v38   ;;  %v1199_v18 = vmul.f32 %v1106_v10, %v975_v12  ;;  %1700 = vmatpush.bf16.msra.mxu0 %v2591_v7  ;;  %2801 = vmatpush.bf16.msra.mxu2 %v2591_v7  ;;  %v2561_v12 = vld [vmem:[%s3413_s6 + $0x24] sm:$0xf]  ;;  %v2370_v38 = vld [vmem:[%s3413_s6 + $0x28] sm:$0xf0]  ;;  %v2437_v7 = vor.u32 %v2577_v13, %v2434_v14 }
 0x185   : > { %v2373_v10 = vor.u32 %v2561_v12, %v2370_v38  ;;  %v2410_v8 = vld [vmem:[%s3413_s6 + $0x78] sm:$0xf0] }
 0x186   : > { %v1116_v20 = vpop.permute.xlu1 %1115  ;;  %1295 = vst [vmem:[%s3607_s20 + $0x80] sm:$0xff] %v1199_v18  ;;  %v2413_v12 = vor.u32 %v2571_v5, %v2410_v8 }
 0x187   : > { %v1201_v22 = vmul.f32 %v1116_v20, %v977_v9  ;;  %v1041_v23 = vpop.permute.xlu0 %1040  ;;  %v2376_v9 = vld [vmem:[%s3413_s6 + $0x30] sm:$0xf]  ;;  %v2564_v20 = vld [vmem:[%s3413_s6 + $0x34] sm:$0xf0] }
 0x188   : > { %v1186_v19 = vmul.f32 %v1041_v23, %v962_v21  ;;  %v2563_v23 = vld [vmem:[%s3413_s6 + $0x34] sm:$0xf] }
 0x189   : > { %1297 = vst [vmem:[%s3607_s20 + $0x90] sm:$0xff] %v1201_v22  ;;  %v2734_v2 = vpack.c.bf16 %v1202_v55, %v1201_v22  ;;  %v2576_v55 = vld [vmem:[%s3413_s6 + $0x94] sm:$0xf0]  ;;  %v2377_v22 = vor.u32 %v2564_v20, %v2376_v9 }
 0x18a   : > { %1282 = vst [vmem:[%s3607_s20 + $0x18] sm:$0xff] %v1186_v19  ;;  %v2694_v24 = vpack.c.bf16 %v1186_v19, %v3738_v35  ;;  %v2425_v57 = vor.u32 %v2576_v55, %v2424_v54  ;;  %v2378_v19 = vld [vmem:[%s3413_s6 + $0x38] sm:$0xf0] }
 0x18b   : > { %2789 = vst [vmem:[#allocation2 + $0x20] sm:$0xff] %v2734_v2   ;;  %v2579_v2 = vld [vmem:[%s3413_s6 + $0xb4] sm:$0xf]  ;;  %v2381_v25 = vor.u32 %v2563_v23, %v2378_v19 }
 0x18c   : > { %2781 = vst [vmem:[#allocation2] sm:$0xff] %v2694_v24   ;;  %v2442_v24 = vld [vmem:[%s3413_s6 + $0xb8] sm:$0xf0] }
 0x18d   : > { %v2445_v26 = vor.u32 %v2579_v2, %v2442_v24 }
 0x18e   : > { %v1031_v29 = vpop.permute.xlu1 %1030 }
 0x18f   : > { %v1184_v30 = vmul.f32 %v1031_v29, %v960_v28  ;;  %v1026_v31 = vpop.permute.xlu0 %1025  ;;  %v2448_v28 = vld [vmem:[%s3413_s6 + $0xc0] sm:$0xf]  ;;  %v2582_v29 = vld [vmem:[%s3413_s6 + $0xc4] sm:$0xf0] }
 0x190   : > { %v1183_v33 = vmul.f32 %v1026_v31, %v959_v3  ;;  %v2384_v3 = vld [vmem:[%s3413_s6 + $0x40] sm:$0xf]  ;;  %v2449_v31 = vor.u32 %v2582_v29, %v2448_v28 }
 0x191   : > { %1280 = vst [vmem:[%s3607_s20 + $0x8] sm:$0xff] %v1184_v30 }
 0x192   : > { %1279 = vst [vmem:[%s3607_s20] sm:$0xff] %v1183_v33  ;;  %v2689_v27 = vpack.c.bf16 %v1184_v30, %v1183_v33  ;;  %v2598_v34 = vld [vmem:[#allocation2 + $0x20] sm:$0xff]  ;;  %v2566_v30 = vld [vmem:[%s3413_s6 + $0x44] sm:$0xf0] }
 0x193   : > { %v2590_v35 = vld [vmem:[#allocation2] sm:$0xff]  ;;  %1790 = vmatpush.bf16.msra.mxu1 %v2598_v34  ;;  %2810 = vmatpush.bf16.msra.mxu3 %v2598_v34  ;;  %v2385_v33 = vor.u32 %v2566_v30, %v2384_v3  ;;  %v2386_v34 = vld [vmem:[%s3413_s6 + $0x48] sm:$0xf0] }
 0x194   : > { %2690 = vst [vmem:[#allocation2 + $0x30] sm:$0xff] %v2689_v27   ;;  %1701 = vmatpush.bf16.msra.mxu0 %v2590_v35  ;;  %2802 = vmatpush.bf16.msra.mxu2 %v2590_v35  ;;  %v2565_v27 = vld [vmem:[%s3413_s6 + $0x44] sm:$0xf] }
 0x195   : > { %v2581_v35 = vld [vmem:[%s3413_s6 + $0xc4] sm:$0xf] }
 0x197   : > { %v1111_v6 = vpop.permute.xlu0 %1110 }
 0x198   : > { %v1200_v37 = vmul.f32 %v1111_v6, %v976_v4  ;;  %v2389_v4 = vor.u32 %v2565_v27, %v2386_v34  ;;  %v2453_v6 = vor.u32 %v2581_v35, %v2450_v36 }
 0x19a   : > { %1296 = vst [vmem:[%s3607_s20 + $0x88] sm:$0xff] %v1200_v37  ;;  %v2729_v47 = vpack.c.bf16 %v1200_v37, %v1199_v18  ;;  %v2580_v18 = vld [vmem:[%s3413_s6 + $0xb4] sm:$0xf0]  ;;  %v2456_v37 = vld [vmem:[%s3413_s6 + $0xd0] sm:$0xf] }
 0x19b   : > { %v2589_v16 = vld [vmem:[#allocation2 + $0x30] sm:$0xff]  ;;  %v2441_v21 = vor.u32 %v2580_v18, %v2440_v15  ;;  %v2457_v46 = vor.u32 %v2584_v41, %v2456_v37 }
 0x19c   : > { %2788 = vst [vmem:[#allocation2 + $0x40] sm:$0xff] %v2729_v47   ;;  %1702 = vmatpush.bf16.msra.mxu0 %v2589_v16  ;;  %2803 = vmatpush.bf16.msra.mxu2 %v2589_v16  ;;  %v2393_v47 = vor.u32 %v2568_v44, %v2392_v61  ;;  %v2567_v16 = vld [vmem:[%s3413_s6 + $0x54] sm:$0xf] }
 0x19f   : > { %1743 = vmatmul.bf16.vlgmr.msra.gmra.mxu2 %v2417_v48  ;;  %1703 = vmatmul.bf16.vlgmr.msra.gmra.mxu0 %v2353_v17  ;;  %v2394_v48 = vld [vmem:[%s3413_s6 + $0x58] sm:$0xf0]  ;;  %v2583_v17 = vld [vmem:[%s3413_s6 + $0xd4] sm:$0xf] }
 0x1a0   : > { %v2397_v45 = vor.u32 %v2567_v16, %v2394_v48  ;;  %v2461_v49 = vor.u32 %v2583_v17, %v2458_v43 }
 0x1a3   : > { %v2597_v50 = vld [vmem:[#allocation2 + $0x40] sm:$0xff] }
 0x1a4   : > { %1791 = vmatpush.bf16.msra.mxu1 %v2597_v50  ;;  %2811 = vmatpush.bf16.msra.mxu3 %v2597_v50  ;;  %v2586_v50 = vld [vmem:[%s3413_s6 + $0xe4] sm:$0xf0] }
 0x1a5   : > { %v2465_v54 = vor.u32 %v2586_v50, %v2464_v32 }
 0x1a7   : > { %1792 = vmatmul.bf16.vlgmr.msra.gmra.mxu1 %v2357_v42  ;;  %1832 = vmatmul.bf16.vlgmr.msra.gmra.mxu3 %v2421_v53  ;;  %v2400_v42 = vld [vmem:[%s3413_s6 + $0x60] sm:$0xf]  ;;  %v2570_v53 = vld [vmem:[%s3413_s6 + $0x64] sm:$0xf0] }
 0x1a8   : > { %v2401_v55 = vor.u32 %v2570_v53, %v2400_v42 }
 0x1af   : > { %1748 = vmatmul.bf16.gmra.mxu2 %v2425_v57  ;;  %1708 = vmatmul.bf16.gmra.mxu0 %v2361_v58  ;;  %v2585_v57 = vld [vmem:[%s3413_s6 + $0xe4] sm:$0xf]  ;;  %v2466_v58 = vld [vmem:[%s3413_s6 + $0xe8] sm:$0xf0] }
 0x1b0   : > { %v2469_v60 = vor.u32 %v2585_v57, %v2466_v58 }
 0x1b7   : > { %1797 = vmatmul.bf16.gmra.mxu1 %v2365_v51  ;;  %1837 = vmatmul.bf16.gmra.mxu3 %v2429_v0  ;;  %v2408_v51 = vld [vmem:[%s3413_s6 + $0x70] sm:$0xf]  ;;  %v2572_v0 = vld [vmem:[%s3413_s6 + $0x74] sm:$0xf0] }
 0x1b8   : > { %v2409_v52 = vor.u32 %v2572_v0, %v2408_v51 }
 0x1bf   : > { %1753 = vmatmul.bf16.gmra.mxu2 %v2433_v40  ;;  %1713 = vmatmul.bf16.gmra.mxu0 %v2369_v11  ;;  %v2587_v40 = vld [vmem:[%s3413_s6 + $0xf4] sm:$0xf]  ;;  %v2474_v11 = vld [vmem:[%s3413_s6 + $0xf8] sm:$0xf0] }
 0x1c0   : > { %v2477_v38 = vor.u32 %v2587_v40, %v2474_v11 }
 0x1c7   : > { %1802 = vmatmul.bf16.gmra.mxu1 %v2373_v10  ;;  %1842 = vmatmul.bf16.gmra.mxu3 %v2437_v7 }
 0x1cf   : > { %1758 = vmatmul.bf16.gmra.mxu2 %v2441_v21  ;;  %1718 = vmatmul.bf16.gmra.mxu0 %v2377_v22 }
 0x1d7   : > { %1807 = vmatmul.bf16.gmra.mxu1 %v2381_v25  ;;  %1847 = vmatmul.bf16.gmra.mxu3 %v2445_v26 }
 0x1df   : > { %1763 = vmatmul.bf16.gmra.mxu2 %v2449_v31  ;;  %1723 = vmatmul.bf16.gmra.mxu0 %v2385_v33 }
 0x1e7   : > { %1812 = vmatmul.bf16.gmra.mxu1 %v2389_v4  ;;  %1852 = vmatmul.bf16.gmra.mxu3 %v2453_v6 }
 0x1ef   : > { %1768 = vmatmul.bf16.gmra.mxu2 %v2457_v46  ;;  %1728 = vmatmul.bf16.gmra.mxu0 %v2393_v47 }
 0x1f7   : > { %1817 = vmatmul.bf16.gmra.mxu1 %v2397_v45  ;;  %1857 = vmatmul.bf16.gmra.mxu3 %v2461_v49 }
 0x1ff   : > { %1773 = vmatmul.bf16.gmra.mxu2 %v2465_v54  ;;  %1733 = vmatmul.bf16.gmra.mxu0 %v2401_v55 }
 0x207   : > { %1822 = vmatmul.bf16.gmra.mxu1 %v2405_v59  ;;  %1862 = vmatmul.bf16.gmra.mxu3 %v2469_v60 }
 0x20f   : > { %1778 = vmatmul.bf16.gmra.mxu2 %v2473_v1  ;;  %1738 = vmatmul.bf16.gmra.mxu0 %v2409_v52 }
 0x217   : > { %1827 = vmatmul.bf16.gmra.mxu1 %v2413_v12  ;;  %1867 = vmatmul.bf16.gmra.mxu3 %v2477_v38 }
 0x21c   : > { %v1704_v13 = vpop.f32.mrf.mxu0 }
 0x222   : > { %v1744_v14 = vpop.f32.mrf.mxu2 }
 0x224   : > { %v1793_v10 = vpop.f32.mrf.mxu1  ;;  %v1706_v7 = vpop.f32.mrf.mxu0 }
 0x225   : > { %v3839_v15 = vadd.f32 %v1793_v10, %v1704_v13 }
 0x22a   : > { %v1746_v18 = vpop.f32.mrf.mxu2  ;;  %v1833_v9 = vpop.f32.mrf.mxu3 }
 0x22b   : > { %v3841_v20 = vadd.f32 %v1833_v9, %v1744_v14 }
 0x22c   : > { %v1795_v21 = vpop.f32.mrf.mxu1  ;;  %v1709_v22 = vpop.f32.mrf.mxu0 }
 0x22d   : > { %v3843_v23 = vadd.f32 %v1795_v21, %v1706_v7 }
 0x232   : > { %v1749_v19 = vpop.f32.mrf.mxu2  ;;  %v1835_v2 = vpop.f32.mrf.mxu3 }
 0x233   : > { %v3845_v24 = vadd.f32 %v1835_v2, %v1746_v18 }
 0x234   : > { %v1798_v25 = vpop.f32.mrf.mxu1  ;;  %v1711_v26 = vpop.f32.mrf.mxu0 }
 0x235   : > { %v3847_v28 = vadd.f32 %v1798_v25, %v1709_v22 }
 0x23a   : > { %v1751_v29 = vpop.f32.mrf.mxu2  ;;  %v1838_v3 = vpop.f32.mrf.mxu3 }
 0x23b   : > { %v3849_v30 = vadd.f32 %v1838_v3, %v1749_v19 }
 0x23c   : > { %v1800_v31 = vpop.f32.mrf.mxu1  ;;  %v1714_v33 = vpop.f32.mrf.mxu0 }
 0x23d   : > { %v3851_v27 = vadd.f32 %v1800_v31, %v1711_v26 }
 0x242   : > { %v1754_v34 = vpop.f32.mrf.mxu2  ;;  %v1840_v35 = vpop.f32.mrf.mxu3 }
 0x243   : > { %v3853_v36 = vadd.f32 %v1840_v35, %v1751_v29 }
 0x244   : > { %v1803_v4 = vpop.f32.mrf.mxu1  ;;  %v1716_v6 = vpop.f32.mrf.mxu0 }
 0x245   : > { %v3855_v37 = vadd.f32 %v1803_v4, %v1714_v33 }
 0x24a   : > { %v1756_v41 = vpop.f32.mrf.mxu2  ;;  %v1843_v61 = vpop.f32.mrf.mxu3 }
 0x24b   : > { %v3857_v44 = vadd.f32 %v1843_v61, %v1754_v34 }
 0x24c   : > { %v1805_v46 = vpop.f32.mrf.mxu1  ;;  %v1719_v47 = vpop.f32.mrf.mxu0 }
 0x24d   : > { %v3859_v16 = vadd.f32 %v1805_v46, %v1716_v6 }
 0x252   : > { %v1759_v48 = vpop.f32.mrf.mxu2  ;;  %v1845_v17 = vpop.f32.mrf.mxu3 }
 0x253   : > { %v3861_v43 = vadd.f32 %v1845_v17, %v1756_v41 }
 0x254   : > { %v1808_v45 = vpop.f32.mrf.mxu1  ;;  %v1721_v49 = vpop.f32.mrf.mxu0 }
 0x255   : > { %v3863_v32 = vadd.f32 %v1808_v45, %v1719_v47 }
 0x25a   : > { %v1761_v50 = vpop.f32.mrf.mxu2  ;;  %v1848_v42 = vpop.f32.mrf.mxu3 }
 0x25b   : > { %v3865_v53 = vadd.f32 %v1848_v42, %v1759_v48 }
 0x25c   : > { %v1810_v54 = vpop.f32.mrf.mxu1  ;;  %v1724_v55 = vpop.f32.mrf.mxu0 }
 0x25d   : > { %v3867_v56 = vadd.f32 %v1810_v54, %v1721_v49 }
 0x262   : > { %v1764_v39 = vpop.f32.mrf.mxu2  ;;  %v1850_v57 = vpop.f32.mrf.mxu3 }
 0x263   : > { %v3869_v58 = vadd.f32 %v1850_v57, %v1761_v50 }
 0x264   : > { %v1813_v59 = vpop.f32.mrf.mxu1  ;;  %v1726_v60 = vpop.f32.mrf.mxu0 }
 0x265   : > { %v3871_v62 = vadd.f32 %v1813_v59, %v1724_v55 }
 0x26a   : > { %v1766_v63 = vpop.f32.mrf.mxu2  ;;  %v1853_v51 = vpop.f32.mrf.mxu3 }
 0x26b   : > { %v3873_v0 = vadd.f32 %v1853_v51, %v1764_v39 }
 0x26c   : > { %v1815_v1 = vpop.f32.mrf.mxu1  ;;  %v1729_v52 = vpop.f32.mrf.mxu0 }
 0x26d   : > { %v3875_v5 = vadd.f32 %v1815_v1, %v1726_v60 }
 0x272   : > { %v1769_v8 = vpop.f32.mrf.mxu2  ;;  %v1855_v40 = vpop.f32.mrf.mxu3 }
 0x273   : > { %v3877_v11 = vadd.f32 %v1855_v40, %v1766_v63 }
 0x274   : > { %v1818_v12 = vpop.f32.mrf.mxu1  ;;  %v1731_v38 = vpop.f32.mrf.mxu0 }
 0x275   : > { %v3879_v13 = vadd.f32 %v1818_v12, %v1729_v52 }
 0x27a   : > { %v1771_v14 = vpop.f32.mrf.mxu2  ;;  %v1858_v10 = vpop.f32.mrf.mxu3 }
 0x27b   : > { %v3881_v7 = vadd.f32 %v1858_v10, %v1769_v8 }
 0x27c   : > { %v1820_v18 = vpop.f32.mrf.mxu1  ;;  %v1734_v21 = vpop.f32.mrf.mxu0 }
 0x27d   : > { %v3883_v9 = vadd.f32 %v1820_v18, %v1731_v38 }
 0x282   : > { %v1860_v22 = vpop.f32.mrf.mxu3  ;;  %v1774_v2 = vpop.f32.mrf.mxu2 }
 0x283   : > { %v3885_v19 = vadd.f32 %v1860_v22, %v1771_v14 }
 0x284   : > { %v1823_v25 = vpop.f32.mrf.mxu1  ;;  %v1736_v29 = vpop.f32.mrf.mxu0 }
 0x285   : > { %v3887_v26 = vadd.f32 %v1823_v25, %v1734_v21 }
 0x28a   : > { %v1863_v3 = vpop.f32.mrf.mxu3  ;;  %v1776_v35 = vpop.f32.mrf.mxu2 }
 0x28b   : > { %v3889_v31 = vadd.f32 %v1863_v3, %v1774_v2 }
 0x28c   : > { %v1825_v33 = vpop.f32.mrf.mxu1  ;;  %v1739_v4 = vpop.f32.mrf.mxu0 }
 0x28d   : > { %v3891_v34 = vadd.f32 %v1825_v33, %v1736_v29 }
 0x292   : > { %v1865_v6 = vpop.f32.mrf.mxu3  ;;  %v1779_v47 = vpop.f32.mrf.mxu2 }
 0x293   : > { %v3893_v41 = vadd.f32 %v1865_v6, %v1776_v35 }
 0x294   : > { %v1828_v61 = vpop.f32.mrf.mxu1  ;;  %v1741_v45 = vpop.f32.mrf.mxu0 }
 0x295   : > { %v3895_v46 = vadd.f32 %v1828_v61, %v1739_v4 }
 0x29a   : > { %v1868_v48 = vpop.f32.mrf.mxu3  ;;  %v1781_v42 = vpop.f32.mrf.mxu2 }
 0x29b   : > { %v3897_v17 = vadd.f32 %v1868_v48, %v1779_v47 }
 0x29c   : > { %v1830_v49 = vpop.f32.mrf.mxu1 }
 0x29d   : > { %v3899_v50 = vadd.f32 %v1830_v49, %v1741_v45 }
 0x29f   : > { %1877 = sbr.rel (%p2542_p7) target bundleno = 708 (0x2c4), region = 90 }
 0x2a2   : > { %v1870_v54 = vpop.f32.mrf.mxu3 }
 0x2a3   : > { %v3901_v55 = vadd.f32 %v1870_v54, %v1781_v42 }
 0x2a4   : > { %1879 = vst [vmem:[%s3904_s26] sm:$0xff] %v3839_v15 }
 0x2a5   : > { %1880 = vst [vmem:[%s3904_s26 + $0x8] sm:$0xff] %v3843_v23 }
 0x2a6   : > { %1881 = vst [vmem:[%s3904_s26 + $0x10] sm:$0xff] %v3847_v28 }
 0x2a7   : > { %1882 = vst [vmem:[%s3904_s26 + $0x18] sm:$0xff] %v3851_v27 }
 0x2a8   : > { %1883 = vst [vmem:[%s3904_s26 + $0x20] sm:$0xff] %v3855_v37 }
 0x2a9   : > { %1884 = vst [vmem:[%s3904_s26 + $0x28] sm:$0xff] %v3859_v16 }
 0x2aa   : > { %1885 = vst [vmem:[%s3904_s26 + $0x30] sm:$0xff] %v3863_v32 }
 0x2ab   : > { %1886 = vst [vmem:[%s3904_s26 + $0x38] sm:$0xff] %v3867_v56 }
 0x2ac   : > { %1887 = vst [vmem:[%s3904_s26 + $0x40] sm:$0xff] %v3871_v62 }
 0x2ad   : > { %1888 = vst [vmem:[%s3904_s26 + $0x48] sm:$0xff] %v3875_v5 }
 0x2ae   : > { %1889 = vst [vmem:[%s3904_s26 + $0x50] sm:$0xff] %v3879_v13 }
 0x2af   : > { %1890 = vst [vmem:[%s3904_s26 + $0x58] sm:$0xff] %v3883_v9 }
 0x2b0   : > { %1891 = vst [vmem:[%s3904_s26 + $0x60] sm:$0xff] %v3887_v26 }
 0x2b1   : > { %1892 = vst [vmem:[%s3904_s26 + $0x68] sm:$0xff] %v3891_v34 }
 0x2b2   : > { %1893 = vst [vmem:[%s3904_s26 + $0x70] sm:$0xff] %v3895_v46 }
 0x2b3   : > { %1894 = vst [vmem:[%s3904_s26 + $0x78] sm:$0xff] %v3899_v50 }
 0x2b4   : > { %1895 = vst [vmem:[%s3904_s26 + $0x80] sm:$0xff] %v3841_v20 }
 0x2b5   : > { %1896 = vst [vmem:[%s3904_s26 + $0x88] sm:$0xff] %v3845_v24 }
 0x2b6   : > { %1897 = vst [vmem:[%s3904_s26 + $0x90] sm:$0xff] %v3849_v30 }
 0x2b7   : > { %1898 = vst [vmem:[%s3904_s26 + $0x98] sm:$0xff] %v3853_v36 }
 0x2b8   : > { %1899 = vst [vmem:[%s3904_s26 + $0xa0] sm:$0xff] %v3857_v44 }
 0x2b9   : > { %1900 = vst [vmem:[%s3904_s26 + $0xa8] sm:$0xff] %v3861_v43 }
 0x2ba   : > { %1901 = vst [vmem:[%s3904_s26 + $0xb0] sm:$0xff] %v3865_v53 }
 0x2bb   : > { %1902 = vst [vmem:[%s3904_s26 + $0xb8] sm:$0xff] %v3869_v58 }
 0x2bc   : > { %1903 = vst [vmem:[%s3904_s26 + $0xc0] sm:$0xff] %v3873_v0 }
 0x2bd   : > { %1904 = vst [vmem:[%s3904_s26 + $0xc8] sm:$0xff] %v3877_v11 }
 0x2be   : > { %1905 = vst [vmem:[%s3904_s26 + $0xd0] sm:$0xff] %v3881_v7 }
 0x2bf   : > { %1906 = vst [vmem:[%s3904_s26 + $0xd8] sm:$0xff] %v3885_v19 }
 0x2c0   : > { %1907 = vst [vmem:[%s3904_s26 + $0xe0] sm:$0xff] %v3889_v31 }
 0x2c1   : > { %1908 = vst [vmem:[%s3904_s26 + $0xe8] sm:$0xff] %v3893_v41 }
 0x2c2   : > { %1909 = vst [vmem:[%s3904_s26 + $0xf0] sm:$0xff] %v3897_v17 }
 0x2c3   : > { %1910 = vst [vmem:[%s3904_s26 + $0xf8] sm:$0xff] %v3901_v55 }
 0x2c4 PF: > { %p2543_p11 = scmp.eq.s32.totalorder %s3123_s30, 0 }
 0x2c6   : > { %1914 = sbr.rel (%p2543_p11) target bundleno = 750 (0x2ee), region = 94 }
 0x2cb   : > { %v1916_v39 = vld [vmem:[%s3904_s26] sm:$0xff]  ;;  %v1917_v57 = vld [vmem:[%s3904_s26 + $0x8] sm:$0xff]  ;;  %v1918_v59 = vld [vmem:[%s3904_s26 + $0x10] sm:$0xff] }
 0x2cc   : > { %v1948_v60 = vadd.f32 %v1916_v39, %v3839_v15  ;;  %v1949_v63 = vadd.f32 %v1917_v57, %v3843_v23  ;;  %v1950_v51 = vadd.f32 %v1918_v59, %v3847_v28  ;;  %v1919_v1 = vld [vmem:[%s3904_s26 + $0x18] sm:$0xff]  ;;  %v1920_v52 = vld [vmem:[%s3904_s26 + $0x20] sm:$0xff]  ;;  %v1921_v8 = vld [vmem:[%s3904_s26 + $0x28] sm:$0xff] }
 0x2cd   : > { %v1951_v40 = vadd.f32 %v1919_v1, %v3851_v27  ;;  %v1922_v12 = vld [vmem:[%s3904_s26 + $0x30] sm:$0xff]  ;;  %v1952_v38 = vadd.f32 %v1920_v52, %v3855_v37  ;;  %v1923_v15 = vld [vmem:[%s3904_s26 + $0x38] sm:$0xff]  ;;  %v1953_v23 = vadd.f32 %v1921_v8, %v3859_v16  ;;  %v1924_v28 = vld [vmem:[%s3904_s26 + $0x40] sm:$0xff] }
 0x2ce   : > { %1980 = vst [vmem:[%s3904_s26] sm:$0xff] %v1948_v60  ;;  %v1954_v14 = vadd.f32 %v1922_v12, %v3863_v32  ;;  %v1925_v27 = vld [vmem:[%s3904_s26 + $0x48] sm:$0xff]  ;;  %v1955_v10 = vadd.f32 %v1923_v15, %v3867_v56  ;;  %v1926_v37 = vld [vmem:[%s3904_s26 + $0x50] sm:$0xff]  ;;  %v1956_v18 = vadd.f32 %v1924_v28, %v3871_v62  ;;  %v1927_v16 = vld [vmem:[%s3904_s26 + $0x58] sm:$0xff] }
 0x2cf   : > { %1981 = vst [vmem:[%s3904_s26 + $0x8] sm:$0xff] %v1949_v63  ;;  %v1957_v21 = vadd.f32 %v1925_v27, %v3875_v5  ;;  %v1928_v32 = vld [vmem:[%s3904_s26 + $0x60] sm:$0xff]  ;;  %v1958_v22 = vadd.f32 %v1926_v37, %v3879_v13  ;;  %v1929_v56 = vld [vmem:[%s3904_s26 + $0x68] sm:$0xff]  ;;  %v1959_v2 = vadd.f32 %v1927_v16, %v3883_v9  ;;  %v1930_v62 = vld [vmem:[%s3904_s26 + $0x70] sm:$0xff] }
 0x2d0   : > { %1982 = vst [vmem:[%s3904_s26 + $0x10] sm:$0xff] %v1950_v51  ;;  %v1960_v25 = vadd.f32 %v1928_v32, %v3887_v26  ;;  %v1931_v5 = vld [vmem:[%s3904_s26 + $0x78] sm:$0xff]  ;;  %v1961_v29 = vadd.f32 %v1929_v56, %v3891_v34  ;;  %v1932_v13 = vld [vmem:[%s3904_s26 + $0x80] sm:$0xff]  ;;  %v1962_v3 = vadd.f32 %v1930_v62, %v3895_v46  ;;  %v1933_v9 = vld [vmem:[%s3904_s26 + $0x88] sm:$0xff] }
 0x2d1   : > { %1983 = vst [vmem:[%s3904_s26 + $0x18] sm:$0xff] %v1951_v40  ;;  %v1963_v33 = vadd.f32 %v1931_v5, %v3899_v50  ;;  %v1934_v26 = vld [vmem:[%s3904_s26 + $0x90] sm:$0xff]  ;;  %v1964_v35 = vadd.f32 %v1932_v13, %v3841_v20  ;;  %v1935_v34 = vld [vmem:[%s3904_s26 + $0x98] sm:$0xff]  ;;  %v1965_v4 = vadd.f32 %v1933_v9, %v3845_v24  ;;  %v1936_v6 = vld [vmem:[%s3904_s26 + $0xa0] sm:$0xff] }
 0x2d2   : > { %1984 = vst [vmem:[%s3904_s26 + $0x20] sm:$0xff] %v1952_v38  ;;  %v1966_v61 = vadd.f32 %v1934_v26, %v3849_v30  ;;  %v1937_v46 = vld [vmem:[%s3904_s26 + $0xa8] sm:$0xff]  ;;  %v1967_v47 = vadd.f32 %v1935_v34, %v3853_v36  ;;  %v1938_v20 = vld [vmem:[%s3904_s26 + $0xb0] sm:$0xff]  ;;  %v1968_v48 = vadd.f32 %v1936_v6, %v3857_v44  ;;  %v1939_v24 = vld [vmem:[%s3904_s26 + $0xb8] sm:$0xff] }
 0x2d3   : > { %1985 = vst [vmem:[%s3904_s26 + $0x28] sm:$0xff] %v1953_v23  ;;  %v1969_v45 = vadd.f32 %v1937_v46, %v3861_v43  ;;  %v1940_v30 = vld [vmem:[%s3904_s26 + $0xc0] sm:$0xff]  ;;  %v1970_v49 = vadd.f32 %v1938_v20, %v3865_v53  ;;  %v1941_v36 = vld [vmem:[%s3904_s26 + $0xc8] sm:$0xff]  ;;  %v1971_v50 = vadd.f32 %v1939_v24, %v3869_v58  ;;  %v1942_v44 = vld [vmem:[%s3904_s26 + $0xd0] sm:$0xff] }
 0x2d4   : > { %1986 = vst [vmem:[%s3904_s26 + $0x30] sm:$0xff] %v1954_v14  ;;  %v1972_v42 = vadd.f32 %v1940_v30, %v3873_v0  ;;  %v1943_v43 = vld [vmem:[%s3904_s26 + $0xd8] sm:$0xff]  ;;  %v1973_v54 = vadd.f32 %v1941_v36, %v3877_v11  ;;  %v1944_v39 = vld [vmem:[%s3904_s26 + $0xe0] sm:$0xff]  ;;  %v1974_v53 = vadd.f32 %v1942_v44, %v3881_v7  ;;  %v1945_v58 = vld [vmem:[%s3904_s26 + $0xe8] sm:$0xff] }
 0x2d5   : > { %1987 = vst [vmem:[%s3904_s26 + $0x38] sm:$0xff] %v1955_v10  ;;  %v1975_v57 = vadd.f32 %v1943_v43, %v3885_v19  ;;  %v1946_v59 = vld [vmem:[%s3904_s26 + $0xf0] sm:$0xff]  ;;  %v1976_v0 = vadd.f32 %v1944_v39, %v3889_v31  ;;  %v1947_v60 = vld [vmem:[%s3904_s26 + $0xf8] sm:$0xff]  ;;  %v1977_v11 = vadd.f32 %v1945_v58, %v3893_v41 }
 0x2d6   : > { %1988 = vst [vmem:[%s3904_s26 + $0x40] sm:$0xff] %v1956_v18  ;;  %v1978_v63 = vadd.f32 %v1946_v59, %v3897_v17  ;;  %v1979_v7 = vadd.f32 %v1947_v60, %v3901_v55 }
 0x2d7   : > { %1989 = vst [vmem:[%s3904_s26 + $0x48] sm:$0xff] %v1957_v21 }
 0x2d8   : > { %1990 = vst [vmem:[%s3904_s26 + $0x50] sm:$0xff] %v1958_v22 }
 0x2d9   : > { %1991 = vst [vmem:[%s3904_s26 + $0x58] sm:$0xff] %v1959_v2 }
 0x2da   : > { %1992 = vst [vmem:[%s3904_s26 + $0x60] sm:$0xff] %v1960_v25 }
 0x2db   : > { %1993 = vst [vmem:[%s3904_s26 + $0x68] sm:$0xff] %v1961_v29 }
 0x2dc   : > { %1994 = vst [vmem:[%s3904_s26 + $0x70] sm:$0xff] %v1962_v3 }
 0x2dd   : > { %1995 = vst [vmem:[%s3904_s26 + $0x78] sm:$0xff] %v1963_v33 }
 0x2de   : > { %1996 = vst [vmem:[%s3904_s26 + $0x80] sm:$0xff] %v1964_v35 }
 0x2df   : > { %1997 = vst [vmem:[%s3904_s26 + $0x88] sm:$0xff] %v1965_v4 }
 0x2e0   : > { %1998 = vst [vmem:[%s3904_s26 + $0x90] sm:$0xff] %v1966_v61 }
 0x2e1   : > { %1999 = vst [vmem:[%s3904_s26 + $0x98] sm:$0xff] %v1967_v47 }
 0x2e2   : > { %2000 = vst [vmem:[%s3904_s26 + $0xa0] sm:$0xff] %v1968_v48 }
 0x2e3   : > { %2001 = vst [vmem:[%s3904_s26 + $0xa8] sm:$0xff] %v1969_v45 }
 0x2e4   : > { %2002 = vst [vmem:[%s3904_s26 + $0xb0] sm:$0xff] %v1970_v49 }
 0x2e5   : > { %2003 = vst [vmem:[%s3904_s26 + $0xb8] sm:$0xff] %v1971_v50 }
 0x2e6   : > { %2004 = vst [vmem:[%s3904_s26 + $0xc0] sm:$0xff] %v1972_v42 }
 0x2e7   : > { %2005 = vst [vmem:[%s3904_s26 + $0xc8] sm:$0xff] %v1973_v54 }
 0x2e8   : > { %2006 = vst [vmem:[%s3904_s26 + $0xd0] sm:$0xff] %v1974_v53 }
 0x2e9   : > { %2007 = vst [vmem:[%s3904_s26 + $0xd8] sm:$0xff] %v1975_v57 }
 0x2ea   : > { %2008 = vst [vmem:[%s3904_s26 + $0xe0] sm:$0xff] %v1976_v0 }
 0x2eb   : > { %2009 = vst [vmem:[%s3904_s26 + $0xe8] sm:$0xff] %v1977_v11 }
 0x2ec   : > { %2010 = vst [vmem:[%s3904_s26 + $0xf0] sm:$0xff] %v1978_v63 }
 0x2ed   : > { %2011 = vst [vmem:[%s3904_s26 + $0xf8] sm:$0xff] %v1979_v7 }
 0x2ee PF: > { %s2017_s17 = sand.u32 1, %s3244_s12   ;;  %s2549_s6 = sshll.u32 %s3123_s30, 5 }
 0x2ef   : > { %s2550_s16 = sshll.u32 %s3127_s8, 7  ;;  %s2054_s22 = sshll.u32 %s3607_s20, 4  ;;  %s2055_s22 = int_to_ptr.vmem [resolvable:$true] %s2054_s22 }
 0x2f0   : > { %s2051_s19 = sadd.s32 %s2550_s16, %s2549_s6  ;;  %s4217_s24 = sld [smem:[#allocation29_spill]] }
 0x2f1   : > { %s2551_s27 = sshll.u32 %s2051_s19, 3  ;;  %s2554_s21 = sshll.u32 %s2051_s19, 2 }
 0x2f2   : > { %s4219_s2 = sld [smem:[#allocation30_spill]]  ;;  %s4080_s12 = scalar_lea.sflag [#allocation9], %s2017_s17 }
 0x2f6   : > { %s4218_s18 = smov %s4217_s24  ;;  %s2053_s15 = scalar_lea.hbm %s4217_s24, %s2551_s27 }
 0x2f7   : > { %s2056_s14 = sshll.u32 %s2053_s15, 4  ;;  %s2977_s19 = scalar_lea.hbm %s4218_s18, 2048  ;;  %s2057_s14 = int_to_ptr.hbm [resolvable:$true] %s2056_s14 }
 0x2f8   : > { %s4078_s3 = scalar_lea.hbm %s4219_s2, %s2554_s21  ;;  %s2971_s30 = sshra.s32 %s2057_s14, 4  ;;  %s2972_s30 = int_to_ptr.hbm [resolvable:$true] %s2971_s30 }
 0x2f9   : > { %s2973_s6 = scalar_lea.hbm %s2972_s30, 256  ;;  %p2978_p1 = scmp.lt.s32.totalorder %s2972_s30, %s4218_s18 }
 0x2fa   : > { %p2974_p13 = scmp.ne.s32.totalorder %s2972_s30, %s2973_s6  ;;  %p2979_p5 = scmp.lt.s32.totalorder %s2977_s19, %s2973_s6 }
 0x2fc   : > { %p2975_p0 = pnand %p2974_p13, %p3300_p2  ;;  %p2980_p9 = por %p2979_p5, %p2978_p1 }
 0x2fe   : > { %p2976_p8 = pneg %p2975_p0 }
 0x300   : > { %p2981_p3 = pnand %p2980_p9, %p2976_p8 }
 0x302   : > { %2984 = shalt.err (!%p2981_p3)
}
 0x303   : > { %s3144_s1 = smov 128   ;;  %s3145_s17 = smov 8  }
 0x304   : > { %2815 = dma.vmem_to_hbm [thread:$0]  (%p3300_p2), %s2055_s22, 4096, %s2057_s14, %s4080_s12, %s3144_s1, %s3144_s1, %s3145_s17  }
 0x305   : > { %s2605_s5 = sshll.u32 %s3127_s8, 8  ;;  %s2035_s24 = sshll.u32 %s3904_s26, 4  ;;  %s2036_s24 = int_to_ptr.vmem [resolvable:$true] %s2035_s24 }
 0x306   : > { %s4221_s30 = sld [smem:[#allocation28_spill]]  ;;  %s2073_s19 = sshll.u32 %s3522_s23, 4  ;;  %s4099_s19 = int_to_ptr.vmem [resolvable:$true] %s2073_s19 }
 0x307   : > { %s4223_s27 = sand.u32 1, %s3103_s25  }
 0x308   : > { %s2013_s13 = scalar_lea.sflag [#allocation6], %s4223_s27 }
 0x30c   : > { %s4222_s20 = smov %s4221_s30  ;;  %s2034_s6 = scalar_lea.hbm %s4221_s30, %s2605_s5 }
 0x30d   : > { %s2037_s16 = sshll.u32 %s2034_s6, 4  ;;  %s3005_s22 = scalar_lea.hbm %s4222_s20, 512  ;;  %s2038_s16 = int_to_ptr.hbm [resolvable:$true] %s2037_s16 }
 0x30e   : > { %s2999_s4 = sshra.s32 %s2038_s16, 4  ;;  %s3000_s4 = int_to_ptr.hbm [resolvable:$true] %s2999_s4 }
 0x30f   : > { %s3001_s18 = scalar_lea.hbm %s3000_s4, 256  ;;  %p3006_p13 = scmp.lt.s32.totalorder %s3000_s4, %s4222_s20 }
 0x310   : > { %p3002_p10 = scmp.ne.s32.totalorder %s3000_s4, %s3001_s18  ;;  %p3007_p0 = scmp.lt.s32.totalorder %s3005_s22, %s3001_s18 }
 0x312   : > { %p3003_p7 = pnand %p3002_p10, %p3283_p12  ;;  %p3008_p8 = por %p3007_p0, %p3006_p13 }
 0x314   : > { %p3004_p11 = pneg %p3003_p7 }
 0x316   : > { %p3009_p1 = pnand %p3008_p8, %p3004_p11 }
 0x318   : > { %3012 = shalt.err (!%p3009_p1)
}
 0x319   : > { %2814 = dma.vmem_to_hbm [thread:$0]  (%p3283_p12), %s2036_s24, 4096, %s2038_s16, %s2013_s13, %s3144_s1, %s3144_s1, %s3145_s17  }
 0x31a   : > { %s2075_s23 = sshll.u32 %s4078_s3, 4  ;;  %s3033_s18 = scalar_lea.hbm %s4219_s2, 1024  ;;  %s2076_s23 = int_to_ptr.hbm [resolvable:$true] %s2075_s23 }
 0x31b   : > { %s3027_s15 = sshra.s32 %s2076_s23, 4  ;;  %s3028_s15 = int_to_ptr.hbm [resolvable:$true] %s3027_s15 }
 0x31c   : > { %s3029_s21 = scalar_lea.hbm %s3028_s15, 128  ;;  %p3034_p10 = scmp.lt.s32.totalorder %s3028_s15, %s4219_s2 }
 0x31d   : > { %p3030_p5 = scmp.ne.s32.totalorder %s3028_s15, %s3029_s21  ;;  %p3035_p7 = scmp.lt.s32.totalorder %s3033_s18, %s3029_s21 }
 0x31f   : > { %p3031_p9 = pnand %p3030_p5, %p3300_p2  ;;  %p3036_p11 = por %p3035_p7, %p3034_p10 }
 0x321   : > { %p3032_p3 = pneg %p3031_p9 }
 0x323   : > { %p3037_p12 = pnand %p3036_p11, %p3032_p3 }
 0x325   : > { %3040 = shalt.err (!%p3037_p12)
}
 0x326   : > { %s3146_s3 = smov 64   ;;  %s3147_s1 = smov 4  }
 0x327   : > { %2816 = dma.vmem_to_hbm [thread:$0]  (%p3300_p2), %s4099_s19, 2048, %s2076_s23, %s4080_s12, %s3146_s3, %s3146_s3, %s3147_s1  }
 0x328 PF: > { %s4224_s0 = sld [smem:[#allocation14_spill]]  ;;  %p2830_p13 = scmp.ge.s32.totalorder %s3139_s11, 2 }
 0x32a   : > { %p2821_p0 = pnand %p2830_p13, %p3304_p4 }
 0x32c   : > { %p2822_p8 = pneg %p2821_p0 }
 0x32e   : > { %s2090_s24 = sand.u32 1, %s4224_s0  }
 0x32f   : > { %s2091_s16 = scalar_lea.sflag [#allocation6], %s2090_s24 }
 0x330   : > { %3090 = dma.done.wait (%p2822_p8), %s2091_s16, 4096  }
 0x331   : > { %3092 = vsyncadd (%p2822_p8), %s2091_s16, 4294963200  ;;  %s4226_s13 = sadd.s32 4294967294, %s3139_s11   ;;  %p2824_p1 = pnand %p2830_p13, %p3311_p6 }
 0x332   : > { %s2100_s26 = sand.u32 1, %s4226_s13  }
 0x333   : > { %p2825_p5 = pneg %p2824_p1  ;;  %s2101_s7 = scalar_lea.sflag [#allocation9], %s2100_s26 }
 0x335   : > { %3094 = dma.done.wait (%p2825_p5), %s2101_s7, 6144  }
 0x336   : > { %3096 = vsyncadd (%p2825_p5), %s2101_s7, 4294961152  ;;  %s27_s11 = sadd.s32 1, %s3139_s11   ;;  %s4228_s12 = sld [smem:[#allocation15_spill]] }
 0x337   : > { %p24_p2 = scmp.ge.s32.totalorder %s27_s11, 10   ;;  %s4229_s26 = sld [smem:[#allocation19_spill]] }
 0x338   : > { %s4230_s19 = sld [smem:[#allocation20_spill]]  ;;  %s4233_s24 = smov %s3103_s25 }
 0x339   : > { %s4231_s22 = sld [smem:[#allocation16_spill]]  ;;  %s4235_s27 = smov %s3115_s28 }
 0x33a   : > { %s4232_s14 = sld [smem:[#allocation17_spill]]  ;;  %s4236_s28 = smov %s3119_s29 }
 0x33b   : > { %s4238_s30 = smov %s3131_s9  ;;  %s4239_s8 = smov %s3135_s10 }
 0x33c   : > { %s4234_s25 = smov %s4228_s12  ;;  %26 = sbr.rel (!%p24_p2) target bundleno = 20 (0x14), region = 186 }
 0x33e   : > { %s4237_s29 = smov %s4230_s19 }
 0x33f   : > { %s4240_s9 = smov %s4231_s22 }
 0x340   : > { %s4241_s10 = smov %s4232_s14 }
 0x341   :  { %2117 = vsyncpa [#allocation5], 1 }
 0x342   :  { %2119 = vsyncpa [#allocation5 + $0x1], 1 }
 0x343   :  { %2120 = vsyncpa [#allocation6], 1 }
 0x344   :  { %2122 = vsyncpa [#allocation6 + $0x1], 1 }
 0x345   :  { %2123 = vsyncpa [#allocation9], 1 }
 0x346   :  { %2125 = vsyncpa [#allocation9 + $0x1], 1 }

</bundles_post_ra>
